<compile_context>
chip_gen: v6e
topology: v6e:2x2x1
jax: 0.10.0
libtpu: 0.0.40
codegen_flags: <defaults>
</compile_context>

<pallas_src>
import functools
import math

import jax
import jax.numpy as jnp
from jax import lax
from jax.experimental import pallas as pl
from jax.experimental.pallas import tpu as pltpu


def _mha_residual_kernel(x_ref, x2_ref, wq_ref, wkv_ref, wo_ref,
                         bq_ref, bkv_ref, bo_ref, o_ref, attn_acc,
                         *, n_head: int):
    # x_ref:  (Lt, N, E) query tile (full batch), x2_ref: (S, N, E) keys/values
    Lt, N, E = x_ref.shape
    hd = E // n_head

    # Hoist weight / bias loads out of the (static) batch loop.
    wq = wq_ref[...]     # (E, E)  bf16, 1/sqrt(hd) pre-folded
    wkv = wkv_ref[...]   # (E, 2E) bf16, [Wk^T | Wv^T]
    wo = wo_ref[...]     # (E, E)  bf16
    bq = bq_ref[...]     # (1, E)  f32, pre-scaled
    bkv = bkv_ref[...]   # (1, 2E) f32
    bo = bo_ref[...]     # (1, E)  f32
    cdt = wq.dtype       # bf16 compute dtype for MXU operands

    for n in range(N):  # static loop over batch elements resident in this block
        xq = x_ref[:, n, :]      # (Lt, E) f32 — also reused for the residual
        xkv = x2_ref[:, n, :]    # (S, E)  f32

        # Fused input projections (bf16 MXU operands, f32 accumulation).
        q = jnp.dot(xq.astype(cdt), wq, preferred_element_type=jnp.float32) + bq
        kv = jnp.dot(xkv.astype(cdt), wkv, preferred_element_type=jnp.float32) + bkv

        q_c = q.astype(cdt)            # (Lt, E)
        k_c = kv[:, :E].astype(cdt)    # (S, E)
        v_c = kv[:, E:].astype(cdt)    # (S, E)

        def head_ctx(sl):
            # scores = q_h @ k_h^T without materializing a transpose:
            # contract the last dim of both operands.
            s = lax.dot_general(q_c[:, sl], k_c[:, sl],
                                (((1,), (1,)), ((), ())),
                                preferred_element_type=jnp.float32)   # (Lt, S)
            s = s - jnp.max(s, axis=-1, keepdims=True)
            p = jnp.exp(s)
            inv = pl.reciprocal(jnp.sum(p, axis=-1, keepdims=True), approx=True)
            p = p * inv
            return jnp.dot(p.astype(cdt), v_c[:, sl],
                           preferred_element_type=jnp.float32)        # (Lt, hd)

        if n_head == 1:
            # Single-head: skip the VMEM scratch round trip entirely.
            ctx = head_ctx(slice(0, E))
        else:
            for h in range(n_head):
                sl = slice(h * hd, (h + 1) * hd)
                # Write this head's context straight into the lane-offset slot
                # of the VMEM scratch accumulator (no python-list concatenate).
                attn_acc[:, sl] = head_ctx(sl)
            ctx = attn_acc[...]

        # Output projection + residual (residual add stays in f32).
        out = jnp.dot(ctx.astype(cdt), wo, preferred_element_type=jnp.float32) + bo
        o_ref[:, n, :] = (out + xq).astype(o_ref.dtype)

    # TODO(synk): attn_mask / key_padding_mask are None in the module's default
    # config and are not implemented here.
    # TODO(synk): for very long sequences add a KV-tile ("arbitrary") grid axis
    # with online-softmax accumulation instead of recomputing the fused K/V
    # projection per query tile and materializing full (Lt, S) scores.


def prepare_params(params, n_head, compute_dtype=jnp.bfloat16):
    """One-time weight prep: transpose, fuse K/V, fold softmax scale, cast bf16."""
    E = params["wq"].shape[0]
    assert E % n_head == 0
    scale = 1.0 / math.sqrt(E // n_head)
    return {
        "wq_t": (params["wq"].T * scale).astype(compute_dtype),              # (E, E)
        "wkv_t": jnp.concatenate([params["wk"].T, params["wv"].T], axis=1)    # (E, 2E)
                 .astype(compute_dtype),
        "wo_t": params["wo"].T.astype(compute_dtype),                         # (E, E)
        "bq": (params["bq"] * scale).reshape(1, E).astype(jnp.float32),
        "bkv": jnp.concatenate([params["bk"], params["bv"]])
               .reshape(1, 2 * E).astype(jnp.float32),
        "bo": params["bo"].reshape(1, E).astype(jnp.float32),
    }


def _largest_divisor_at_most(n, cap):
    cap = max(1, min(n, cap))
    for d in range(cap, 0, -1):
        if n % d == 0:
            return d
    return 1


def _vmem_limit_bytes(block_q, S, N, E):
    f32, bf16 = 4, 2
    act = (2 * block_q * N * E + S * N * E) * f32 * 2          # double-buffered in/out tiles
    wts = (E * E + 2 * E * E + E * E) * bf16 * 2               # weight tiles
    scratch = block_q * E * f32
    work = (block_q * (3 * E + S) + 3 * S * E) * f32 * 4       # q/kv/scores temps (generous)
    est = act + wts + scratch + work
    # Clamp: at least the default scoped window, at most 64 MiB (v7x headroom).
    return int(min(64 * 2 ** 20, max(32 * 2 ** 20, 2 * est)))


def _cost_estimate(L, S, N, E, n_tiles):
    f32 = 4
    flops = (
        2 * L * N * E * E                 # Q projection
        + 2 * S * N * (2 * E) * E * n_tiles   # fused K/V projection (recomputed per tile)
        + 2 * L * N * S * E               # scores (summed over heads)
        + 2 * L * N * S * E               # probs @ V
        + 2 * L * N * E * E               # output projection
    )
    transcendentals = L * N * S           # exp in softmax
    bytes_accessed = (
        L * N * E * f32                   # x
        + S * N * E * f32 * n_tiles       # x2 re-fetched per query tile
        + 4 * E * E * 2 * n_tiles         # bf16 weights per tile
        + L * N * E * f32                 # output
    )
    return pl.CostEstimate(flops=flops, transcendentals=transcendentals,
                           bytes_accessed=bytes_accessed)


def residual_attention_block(x, x2, prepared, n_head, block_q=None):
    """x: (L, N, E) queries, x2: (S, N, E) keys/values. Returns (L, N, E)."""
    L, N, E = x.shape
    S = x2.shape[0]

    if block_q is None:
        cap = max(1, min(L, 1024 // max(N, 1)))
        if L >= 2:
            cap = min(cap, max(1, L // 2))   # keep >=2 parallel grid steps (v7x megacore)
        block_q = _largest_divisor_at_most(L, cap)
    assert L % block_q == 0
    n_tiles = L // block_q
    grid = (n_tiles,)

    out = pl.pallas_call(
        functools.partial(_mha_residual_kernel, n_head=n_head),
        out_shape=jax.ShapeDtypeStruct((L, N, E), x.dtype),
        grid_spec=pltpu.PrefetchScalarGridSpec(
            num_scalar_prefetch=0,
            grid=grid,
            in_specs=[
                pl.BlockSpec((block_q, N, E), lambda i: (i, 0, 0)),  # x (query tile)
                pl.BlockSpec((S, N, E), lambda i: (0, 0, 0)),        # x2 (full, resident)
                pl.BlockSpec((E, E), lambda i: (0, 0)),              # Wq^T * scale
                pl.BlockSpec((E, 2 * E), lambda i: (0, 0)),          # [Wk^T | Wv^T]
                pl.BlockSpec((E, E), lambda i: (0, 0)),              # Wo^T
                pl.BlockSpec((1, E), lambda i: (0, 0)),              # bq * scale
                pl.BlockSpec((1, 2 * E), lambda i: (0, 0)),          # [bk | bv]
                pl.BlockSpec((1, E), lambda i: (0, 0)),              # bo
            ],
            out_specs=pl.BlockSpec((block_q, N, E), lambda i: (i, 0, 0)),
            scratch_shapes=[pltpu.VMEM((block_q, E), jnp.float32)],
        ),
        compiler_params=pltpu.CompilerParams(
            dimension_semantics=("parallel",),
            vmem_limit_bytes=_vmem_limit_bytes(block_q, S, N, E),
        ),
        cost_estimate=_cost_estimate(L, S, N, E, n_tiles),
    )(x, x2, prepared["wq_t"], prepared["wkv_t"], prepared["wo_t"],
      prepared["bq"], prepared["bkv"], prepared["bo"])

    return out


def reference_mha_residual(x, x2, params, n_head):
    """Pure-JAX f32 reference mirroring torch.nn.MultiheadAttention semantics."""
    L, N, E = x.shape
    S = x2.shape[0]
    hd = E // n_head
    scale = 1.0 / math.sqrt(hd)

    q = jnp.einsum("lne,oe->lno", x, params["wq"]) + params["bq"]
    k = jnp.einsum("sne,oe->sno", x2, params["wk"]) + params["bk"]
    v = jnp.einsum("sne,oe->sno", x2, params["wv"]) + params["bv"]

    qh = q.reshape(L, N, n_head, hd).transpose(1, 2, 0, 3)
    kh = k.reshape(S, N, n_head, hd).transpose(1, 2, 0, 3)
    vh = v.reshape(S, N, n_head, hd).transpose(1, 2, 0, 3)

    scores = jnp.einsum("nhld,nhsd->nhls", qh, kh) * scale
    probs = jax.nn.softmax(scores, axis=-1)
    ctx = jnp.einsum("nhls,nhsd->nhld", probs, vh)
    ctx = ctx.transpose(2, 0, 1, 3).reshape(L, N, E)

    out = jnp.einsum("lne,oe->lno", ctx, params["wo"]) + params["bo"]
    return out + x


def make_params(key, d_model):
    keys = jax.random.split(key, 8)
    scale = 0.05
    return {
        "wq": scale * jax.random.normal(keys[0], (d_model, d_model), jnp.float32),
        "wk": scale * jax.random.normal(keys[1], (d_model, d_model), jnp.float32),
        "wv": scale * jax.random.normal(keys[2], (d_model, d_model), jnp.float32),
        "wo": scale * jax.random.normal(keys[3], (d_model, d_model), jnp.float32),
        "bq": scale * jax.random.normal(keys[4], (d_model,), jnp.float32),
        "bk": scale * jax.random.normal(keys[5], (d_model,), jnp.float32),
        "bv": scale * jax.random.normal(keys[6], (d_model,), jnp.float32),
        "bo": scale * jax.random.normal(keys[7], (d_model,), jnp.float32),
    }


if __name__ == "__main__":
    # Small shapes consistent with the module's forward:
    #   x: (L, N, d_model) queries, x2: (S, N, d_model) keys/values
    L, S, N, D_MODEL, N_HEAD = 8, 8, 2, 32, 4

    root = jax.random.PRNGKey(0)
    k_x, k_x2, k_p = jax.random.split(root, 3)
    x = jax.random.normal(k_x, (L, N, D_MODEL), jnp.float32)
    x2 = jax.random.normal(k_x2, (S, N, D_MODEL), jnp.float32)
    params = make_params(k_p, D_MODEL)

    prepared = prepare_params(params, N_HEAD)           # one-time weight prep
    out = residual_attention_block(x, x2, prepared, N_HEAD)
    out = jax.block_until_ready(out)

    ref = reference_mha_residual(x, x2, params, N_HEAD)
    assert out.shape == (L, N, D_MODEL)
    # bf16 MXU operands + approx reciprocal => compare with bf16-level tolerance.
    assert jnp.allclose(out, ref, atol=2e-2, rtol=2e-2), (
        f"max abs diff = {jnp.max(jnp.abs(out - ref))}"
    )

    print("KERNEL_OK")
</pallas_src>

<mosaic_0001>
module attributes {stable_mosaic.version = 11 : i64} {
  func.func @_mha_residual_kernel(%arg0: i32, %arg1: memref<4x2x32xf32, #tpu.memory_space<vmem>>, %arg2: memref<8x2x32xf32, #tpu.memory_space<vmem>>, %arg3: memref<32x32xbf16, #tpu.memory_space<vmem>>, %arg4: memref<32x64xbf16, #tpu.memory_space<vmem>>, %arg5: memref<32x32xbf16, #tpu.memory_space<vmem>>, %arg6: memref<1x32xf32, #tpu.memory_space<vmem>>, %arg7: memref<1x64xf32, #tpu.memory_space<vmem>>, %arg8: memref<1x32xf32, #tpu.memory_space<vmem>>, %arg9: memref<4x2x32xf32, #tpu.memory_space<vmem>>, %arg10: memref<4x32xf32, #tpu.memory_space<vmem>>) attributes {dimension_semantics = [#tpu.dimension_semantics<parallel>], iteration_bounds = array<i64: 2>, scalar_prefetch = 0 : i64, scratch_operands = 1 : i64, tpu.core_type = #tpu.core_type<tc>, window_params = [{transform_indices = @transform_0, window_bounds = array<i64: 4, 2, 32>}, {pipeline_mode = #tpu.pipeline_mode<synchronous>, transform_indices = @transform_1, window_bounds = array<i64: 8, 2, 32>}, {pipeline_mode = #tpu.pipeline_mode<synchronous>, transform_indices = @transform_2, window_bounds = array<i64: 32, 32>}, {pipeline_mode = #tpu.pipeline_mode<synchronous>, transform_indices = @transform_3, window_bounds = array<i64: 32, 64>}, {pipeline_mode = #tpu.pipeline_mode<synchronous>, transform_indices = @transform_4, window_bounds = array<i64: 32, 32>}, {pipeline_mode = #tpu.pipeline_mode<synchronous>, transform_indices = @transform_5, window_bounds = array<i64: 1, 32>}, {pipeline_mode = #tpu.pipeline_mode<synchronous>, transform_indices = @transform_6, window_bounds = array<i64: 1, 64>}, {pipeline_mode = #tpu.pipeline_mode<synchronous>, transform_indices = @transform_7, window_bounds = array<i64: 1, 32>}, {transform_indices = @transform_8, window_bounds = array<i64: 4, 2, 32>}]} {
    %c0 = arith.constant 0 : index
    %c0_0 = arith.constant 0 : index
    %0 = vector.load %arg3[%c0, %c0_0] : memref<32x32xbf16, #tpu.memory_space<vmem>>, vector<32x32xbf16>
    %c0_1 = arith.constant 0 : index
    %c0_2 = arith.constant 0 : index
    %1 = vector.load %arg4[%c0_1, %c0_2] : memref<32x64xbf16, #tpu.memory_space<vmem>>, vector<32x64xbf16>
    %c0_3 = arith.constant 0 : index
    %c0_4 = arith.constant 0 : index
    %2 = vector.load %arg5[%c0_3, %c0_4] : memref<32x32xbf16, #tpu.memory_space<vmem>>, vector<32x32xbf16>
    %c0_5 = arith.constant 0 : index
    %c0_6 = arith.constant 0 : index
    %3 = vector.load %arg6[%c0_5, %c0_6] : memref<1x32xf32, #tpu.memory_space<vmem>>, vector<1x32xf32>
    %c0_7 = arith.constant 0 : index
    %c0_8 = arith.constant 0 : index
    %4 = vector.load %arg7[%c0_7, %c0_8] : memref<1x64xf32, #tpu.memory_space<vmem>>, vector<1x64xf32>
    %c0_9 = arith.constant 0 : index
    %c0_10 = arith.constant 0 : index
    %5 = vector.load %arg8[%c0_9, %c0_10] : memref<1x32xf32, #tpu.memory_space<vmem>>, vector<1x32xf32>
    %c0_11 = arith.constant 0 : index
    %c0_12 = arith.constant 0 : index
    %c0_13 = arith.constant 0 : index
    %6 = vector.load %arg1[%c0_11, %c0_12, %c0_13] : memref<4x2x32xf32, #tpu.memory_space<vmem>>, vector<4x1x32xf32>
    %7 = vector.shape_cast %6 : vector<4x1x32xf32> to vector<4x32xf32>
    %c0_14 = arith.constant 0 : index
    %c0_15 = arith.constant 0 : index
    %c0_16 = arith.constant 0 : index
    %8 = vector.load %arg2[%c0_14, %c0_15, %c0_16] : memref<8x2x32xf32, #tpu.memory_space<vmem>>, vector<8x1x32xf32>
    %9 = vector.shape_cast %8 : vector<8x1x32xf32> to vector<8x32xf32>
    %10 = arith.truncf %7 : vector<4x32xf32> to vector<4x32xbf16>
    %cst = arith.constant dense<0.000000e+00> : vector<4x32xf32>
    %11 = tpu.matmul %10, %0, %cst {dimension_numbers = #tpu.dot_dimension_numbers<[1], [0], [0], [1], [0, 0, 1, 1], [], []>} : vector<4x32xbf16>, vector<32x32xbf16>, vector<4x32xf32> -> vector<4x32xf32>
    %12 = vector.broadcast %3 : vector<1x32xf32> to vector<4x32xf32>
    %13 = arith.addf %11, %12 : vector<4x32xf32>
    %14 = arith.truncf %9 : vector<8x32xf32> to vector<8x32xbf16>
    %cst_17 = arith.constant dense<0.000000e+00> : vector<8x64xf32>
    %15 = tpu.matmul %14, %1, %cst_17 {dimension_numbers = #tpu.dot_dimension_numbers<[1], [0], [0], [1], [0, 0, 1, 1], [], []>} : vector<8x32xbf16>, vector<32x64xbf16>, vector<8x64xf32> -> vector<8x64xf32>
    %16 = vector.broadcast %4 : vector<1x64xf32> to vector<8x64xf32>
    %17 = arith.addf %15, %16 : vector<8x64xf32>
    %18 = arith.truncf %13 : vector<4x32xf32> to vector<4x32xbf16>
    %19 = vector.extract_strided_slice %17 {offsets = [0, 0], sizes = [8, 32], strides = [1, 1]} : vector<8x64xf32> to vector<8x32xf32>
    %20 = arith.truncf %19 : vector<8x32xf32> to vector<8x32xbf16>
    %21 = vector.extract_strided_slice %17 {offsets = [0, 32], sizes = [8, 32], strides = [1, 1]} : vector<8x64xf32> to vector<8x32xf32>
    %22 = arith.truncf %21 : vector<8x32xf32> to vector<8x32xbf16>
    %23 = vector.extract_strided_slice %18 {offsets = [0, 0], sizes = [4, 8], strides = [1, 1]} : vector<4x32xbf16> to vector<4x8xbf16>
    %24 = vector.extract_strided_slice %20 {offsets = [0, 0], sizes = [8, 8], strides = [1, 1]} : vector<8x32xbf16> to vector<8x8xbf16>
    %cst_18 = arith.constant dense<0.000000e+00> : vector<4x8xf32>
    %25 = tpu.matmul %23, %24, %cst_18 {dimension_numbers = #tpu.dot_dimension_numbers<[1], [1], [0], [0], [0, 0, 1, 0], [], []>} : vector<4x8xbf16>, vector<8x8xbf16>, vector<4x8xf32> -> vector<4x8xf32>
    %cst_19 = arith.constant dense<0xFF800000> : vector<4xf32>
    %26 = vector.multi_reduction <maximumf>, %25, %cst_19 [1] : vector<4x8xf32> to vector<4xf32>
    %27 = vector.shape_cast %26 : vector<4xf32> to vector<4x1xf32>
    %28 = vector.broadcast %27 : vector<4x1xf32> to vector<4x8xf32>
    %29 = arith.subf %25, %28 : vector<4x8xf32>
    %30 = math.exp %29 : vector<4x8xf32>
    %cst_20 = arith.constant dense<0.000000e+00> : vector<4xf32>
    %31 = vector.multi_reduction <add>, %30, %cst_20 [1] : vector<4x8xf32> to vector<4xf32>
    %32 = vector.shape_cast %31 : vector<4xf32> to vector<4x1xf32>
    %33 = tpu.reciprocal %32 {approx = true} : vector<4x1xf32> -> vector<4x1xf32>
    %34 = vector.broadcast %33 : vector<4x1xf32> to vector<4x8xf32>
    %35 = arith.mulf %30, %34 : vector<4x8xf32>
    %36 = arith.truncf %35 : vector<4x8xf32> to vector<4x8xbf16>
    %37 = vector.extract_strided_slice %22 {offsets = [0, 0], sizes = [8, 8], strides = [1, 1]} : vector<8x32xbf16> to vector<8x8xbf16>
    %cst_21 = arith.constant dense<0.000000e+00> : vector<4x8xf32>
    %38 = tpu.matmul %36, %37, %cst_21 {dimension_numbers = #tpu.dot_dimension_numbers<[1], [0], [0], [1], [0, 0, 1, 1], [], []>} : vector<4x8xbf16>, vector<8x8xbf16>, vector<4x8xf32> -> vector<4x8xf32>
    %c0_22 = arith.constant 0 : index
    %c0_23 = arith.constant 0 : index
    %39 = vector.load %arg10[%c0_22, %c0_23] : memref<4x32xf32, #tpu.memory_space<vmem>>, vector<4x8xf32>
    tpu.vector_store %arg10[%c0_22, %c0_23], %38 {strides = array<i32>} : memref<4x32xf32, #tpu.memory_space<vmem>>, vector<4x8xf32>,
    %40 = vector.extract_strided_slice %18 {offsets = [0, 8], sizes = [4, 8], strides = [1, 1]} : vector<4x32xbf16> to vector<4x8xbf16>
    %41 = vector.extract_strided_slice %20 {offsets = [0, 8], sizes = [8, 8], strides = [1, 1]} : vector<8x32xbf16> to vector<8x8xbf16>
    %cst_24 = arith.constant dense<0.000000e+00> : vector<4x8xf32>
    %42 = tpu.matmul %40, %41, %cst_24 {dimension_numbers = #tpu.dot_dimension_numbers<[1], [1], [0], [0], [0, 0, 1, 0], [], []>} : vector<4x8xbf16>, vector<8x8xbf16>, vector<4x8xf32> -> vector<4x8xf32>
    %cst_25 = arith.constant dense<0xFF800000> : vector<4xf32>
    %43 = vector.multi_reduction <maximumf>, %42, %cst_25 [1] : vector<4x8xf32> to vector<4xf32>
    %44 = vector.shape_cast %43 : vector<4xf32> to vector<4x1xf32>
    %45 = vector.broadcast %44 : vector<4x1xf32> to vector<4x8xf32>
    %46 = arith.subf %42, %45 : vector<4x8xf32>
    %47 = math.exp %46 : vector<4x8xf32>
    %cst_26 = arith.constant dense<0.000000e+00> : vector<4xf32>
    %48 = vector.multi_reduction <add>, %47, %cst_26 [1] : vector<4x8xf32> to vector<4xf32>
    %49 = vector.shape_cast %48 : vector<4xf32> to vector<4x1xf32>
    %50 = tpu.reciprocal %49 {approx = true} : vector<4x1xf32> -> vector<4x1xf32>
    %51 = vector.broadcast %50 : vector<4x1xf32> to vector<4x8xf32>
    %52 = arith.mulf %47, %51 : vector<4x8xf32>
    %53 = arith.truncf %52 : vector<4x8xf32> to vector<4x8xbf16>
    %54 = vector.extract_strided_slice %22 {offsets = [0, 8], sizes = [8, 8], strides = [1, 1]} : vector<8x32xbf16> to vector<8x8xbf16>
    %cst_27 = arith.constant dense<0.000000e+00> : vector<4x8xf32>
    %55 = tpu.matmul %53, %54, %cst_27 {dimension_numbers = #tpu.dot_dimension_numbers<[1], [0], [0], [1], [0, 0, 1, 1], [], []>} : vector<4x8xbf16>, vector<8x8xbf16>, vector<4x8xf32> -> vector<4x8xf32>
    %c0_28 = arith.constant 0 : index
    %c8 = arith.constant 8 : index
    %56 = vector.load %arg10[%c0_28, %c8] : memref<4x32xf32, #tpu.memory_space<vmem>>, vector<4x8xf32>
    tpu.vector_store %arg10[%c0_28, %c8], %55 {strides = array<i32>} : memref<4x32xf32, #tpu.memory_space<vmem>>, vector<4x8xf32>,
    %57 = vector.extract_strided_slice %18 {offsets = [0, 16], sizes = [4, 8], strides = [1, 1]} : vector<4x32xbf16> to vector<4x8xbf16>
    %58 = vector.extract_strided_slice %20 {offsets = [0, 16], sizes = [8, 8], strides = [1, 1]} : vector<8x32xbf16> to vector<8x8xbf16>
    %cst_29 = arith.constant dense<0.000000e+00> : vector<4x8xf32>
    %59 = tpu.matmul %57, %58, %cst_29 {dimension_numbers = #tpu.dot_dimension_numbers<[1], [1], [0], [0], [0, 0, 1, 0], [], []>} : vector<4x8xbf16>, vector<8x8xbf16>, vector<4x8xf32> -> vector<4x8xf32>
    %cst_30 = arith.constant dense<0xFF800000> : vector<4xf32>
    %60 = vector.multi_reduction <maximumf>, %59, %cst_30 [1] : vector<4x8xf32> to vector<4xf32>
    %61 = vector.shape_cast %60 : vector<4xf32> to vector<4x1xf32>
    %62 = vector.broadcast %61 : vector<4x1xf32> to vector<4x8xf32>
    %63 = arith.subf %59, %62 : vector<4x8xf32>
    %64 = math.exp %63 : vector<4x8xf32>
    %cst_31 = arith.constant dense<0.000000e+00> : vector<4xf32>
    %65 = vector.multi_reduction <add>, %64, %cst_31 [1] : vector<4x8xf32> to vector<4xf32>
    %66 = vector.shape_cast %65 : vector<4xf32> to vector<4x1xf32>
    %67 = tpu.reciprocal %66 {approx = true} : vector<4x1xf32> -> vector<4x1xf32>
    %68 = vector.broadcast %67 : vector<4x1xf32> to vector<4x8xf32>
    %69 = arith.mulf %64, %68 : vector<4x8xf32>
    %70 = arith.truncf %69 : vector<4x8xf32> to vector<4x8xbf16>
    %71 = vector.extract_strided_slice %22 {offsets = [0, 16], sizes = [8, 8], strides = [1, 1]} : vector<8x32xbf16> to vector<8x8xbf16>
    %cst_32 = arith.constant dense<0.000000e+00> : vector<4x8xf32>
    %72 = tpu.matmul %70, %71, %cst_32 {dimension_numbers = #tpu.dot_dimension_numbers<[1], [0], [0], [1], [0, 0, 1, 1], [], []>} : vector<4x8xbf16>, vector<8x8xbf16>, vector<4x8xf32> -> vector<4x8xf32>
    %c0_33 = arith.constant 0 : index
    %c16 = arith.constant 16 : index
    %73 = vector.load %arg10[%c0_33, %c16] : memref<4x32xf32, #tpu.memory_space<vmem>>, vector<4x8xf32>
    tpu.vector_store %arg10[%c0_33, %c16], %72 {strides = array<i32>} : memref<4x32xf32, #tpu.memory_space<vmem>>, vector<4x8xf32>,
    %74 = vector.extract_strided_slice %18 {offsets = [0, 24], sizes = [4, 8], strides = [1, 1]} : vector<4x32xbf16> to vector<4x8xbf16>
    %75 = vector.extract_strided_slice %20 {offsets = [0, 24], sizes = [8, 8], strides = [1, 1]} : vector<8x32xbf16> to vector<8x8xbf16>
    %cst_34 = arith.constant dense<0.000000e+00> : vector<4x8xf32>
    %76 = tpu.matmul %74, %75, %cst_34 {dimension_numbers = #tpu.dot_dimension_numbers<[1], [1], [0], [0], [0, 0, 1, 0], [], []>} : vector<4x8xbf16>, vector<8x8xbf16>, vector<4x8xf32> -> vector<4x8xf32>
    %cst_35 = arith.constant dense<0xFF800000> : vector<4xf32>
    %77 = vector.multi_reduction <maximumf>, %76, %cst_35 [1] : vector<4x8xf32> to vector<4xf32>
    %78 = vector.shape_cast %77 : vector<4xf32> to vector<4x1xf32>
    %79 = vector.broadcast %78 : vector<4x1xf32> to vector<4x8xf32>
    %80 = arith.subf %76, %79 : vector<4x8xf32>
    %81 = math.exp %80 : vector<4x8xf32>
    %cst_36 = arith.constant dense<0.000000e+00> : vector<4xf32>
    %82 = vector.multi_reduction <add>, %81, %cst_36 [1] : vector<4x8xf32> to vector<4xf32>
    %83 = vector.shape_cast %82 : vector<4xf32> to vector<4x1xf32>
    %84 = tpu.reciprocal %83 {approx = true} : vector<4x1xf32> -> vector<4x1xf32>
    %85 = vector.broadcast %84 : vector<4x1xf32> to vector<4x8xf32>
    %86 = arith.mulf %81, %85 : vector<4x8xf32>
    %87 = arith.truncf %86 : vector<4x8xf32> to vector<4x8xbf16>
    %88 = vector.extract_strided_slice %22 {offsets = [0, 24], sizes = [8, 8], strides = [1, 1]} : vector<8x32xbf16> to vector<8x8xbf16>
    %cst_37 = arith.constant dense<0.000000e+00> : vector<4x8xf32>
    %89 = tpu.matmul %87, %88, %cst_37 {dimension_numbers = #tpu.dot_dimension_numbers<[1], [0], [0], [1], [0, 0, 1, 1], [], []>} : vector<4x8xbf16>, vector<8x8xbf16>, vector<4x8xf32> -> vector<4x8xf32>
    %c0_38 = arith.constant 0 : index
    %c24 = arith.constant 24 : index
    %90 = vector.load %arg10[%c0_38, %c24] : memref<4x32xf32, #tpu.memory_space<vmem>>, vector<4x8xf32>
    tpu.vector_store %arg10[%c0_38, %c24], %89 {strides = array<i32>} : memref<4x32xf32, #tpu.memory_space<vmem>>, vector<4x8xf32>,
    %c0_39 = arith.constant 0 : index
    %c0_40 = arith.constant 0 : index
    %91 = vector.load %arg10[%c0_39, %c0_40] : memref<4x32xf32, #tpu.memory_space<vmem>>, vector<4x32xf32>
    %92 = arith.truncf %91 : vector<4x32xf32> to vector<4x32xbf16>
    %cst_41 = arith.constant dense<0.000000e+00> : vector<4x32xf32>
    %93 = tpu.matmul %92, %2, %cst_41 {dimension_numbers = #tpu.dot_dimension_numbers<[1], [0], [0], [1], [0, 0, 1, 1], [], []>} : vector<4x32xbf16>, vector<32x32xbf16>, vector<4x32xf32> -> vector<4x32xf32>
    %94 = vector.broadcast %5 : vector<1x32xf32> to vector<4x32xf32>
    %95 = arith.addf %93, %94 : vector<4x32xf32>
    %96 = arith.addf %95, %7 : vector<4x32xf32>
    %c0_42 = arith.constant 0 : index
    %c0_43 = arith.constant 0 : index
    %c0_44 = arith.constant 0 : index
    %97 = vector.load %arg9[%c0_42, %c0_43, %c0_44] : memref<4x2x32xf32, #tpu.memory_space<vmem>>, vector<4x1x32xf32>
    %98 = vector.shape_cast %97 : vector<4x1x32xf32> to vector<4x32xf32>
    %99 = vector.shape_cast %96 : vector<4x32xf32> to vector<4x1x32xf32>
    tpu.vector_store %arg9[%c0_42, %c0_43, %c0_44], %99 {strides = array<i32>} : memref<4x2x32xf32, #tpu.memory_space<vmem>>, vector<4x1x32xf32>,
    %c0_45 = arith.constant 0 : index
    %c1 = arith.constant 1 : index
    %c0_46 = arith.constant 0 : index
    %100 = vector.load %arg1[%c0_45, %c1, %c0_46] : memref<4x2x32xf32, #tpu.memory_space<vmem>>, vector<4x1x32xf32>
    %101 = vector.shape_cast %100 : vector<4x1x32xf32> to vector<4x32xf32>
    %c0_47 = arith.constant 0 : index
    %c1_48 = arith.constant 1 : index
    %c0_49 = arith.constant 0 : index
    %102 = vector.load %arg2[%c0_47, %c1_48, %c0_49] : memref<8x2x32xf32, #tpu.memory_space<vmem>>, vector<8x1x32xf32>
    %103 = vector.shape_cast %102 : vector<8x1x32xf32> to vector<8x32xf32>
    %104 = arith.truncf %101 : vector<4x32xf32> to vector<4x32xbf16>
    %cst_50 = arith.constant dense<0.000000e+00> : vector<4x32xf32>
    %105 = tpu.matmul %104, %0, %cst_50 {dimension_numbers = #tpu.dot_dimension_numbers<[1], [0], [0], [1], [0, 0, 1, 1], [], []>} : vector<4x32xbf16>, vector<32x32xbf16>, vector<4x32xf32> -> vector<4x32xf32>
    %106 = vector.broadcast %3 : vector<1x32xf32> to vector<4x32xf32>
    %107 = arith.addf %105, %106 : vector<4x32xf32>
    %108 = arith.truncf %103 : vector<8x32xf32> to vector<8x32xbf16>
    %cst_51 = arith.constant dense<0.000000e+00> : vector<8x64xf32>
    %109 = tpu.matmul %108, %1, %cst_51 {dimension_numbers = #tpu.dot_dimension_numbers<[1], [0], [0], [1], [0, 0, 1, 1], [], []>} : vector<8x32xbf16>, vector<32x64xbf16>, vector<8x64xf32> -> vector<8x64xf32>
    %110 = vector.broadcast %4 : vector<1x64xf32> to vector<8x64xf32>
    %111 = arith.addf %109, %110 : vector<8x64xf32>
    %112 = arith.truncf %107 : vector<4x32xf32> to vector<4x32xbf16>
    %113 = vector.extract_strided_slice %111 {offsets = [0, 0], sizes = [8, 32], strides = [1, 1]} : vector<8x64xf32> to vector<8x32xf32>
    %114 = arith.truncf %113 : vector<8x32xf32> to vector<8x32xbf16>
    %115 = vector.extract_strided_slice %111 {offsets = [0, 32], sizes = [8, 32], strides = [1, 1]} : vector<8x64xf32> to vector<8x32xf32>
    %116 = arith.truncf %115 : vector<8x32xf32> to vector<8x32xbf16>
    %117 = vector.extract_strided_slice %112 {offsets = [0, 0], sizes = [4, 8], strides = [1, 1]} : vector<4x32xbf16> to vector<4x8xbf16>
    %118 = vector.extract_strided_slice %114 {offsets = [0, 0], sizes = [8, 8], strides = [1, 1]} : vector<8x32xbf16> to vector<8x8xbf16>
    %cst_52 = arith.constant dense<0.000000e+00> : vector<4x8xf32>
    %119 = tpu.matmul %117, %118, %cst_52 {dimension_numbers = #tpu.dot_dimension_numbers<[1], [1], [0], [0], [0, 0, 1, 0], [], []>} : vector<4x8xbf16>, vector<8x8xbf16>, vector<4x8xf32> -> vector<4x8xf32>
    %cst_53 = arith.constant dense<0xFF800000> : vector<4xf32>
    %120 = vector.multi_reduction <maximumf>, %119, %cst_53 [1] : vector<4x8xf32> to vector<4xf32>
    %121 = vector.shape_cast %120 : vector<4xf32> to vector<4x1xf32>
    %122 = vector.broadcast %121 : vector<4x1xf32> to vector<4x8xf32>
    %123 = arith.subf %119, %122 : vector<4x8xf32>
    %124 = math.exp %123 : vector<4x8xf32>
    %cst_54 = arith.constant dense<0.000000e+00> : vector<4xf32>
    %125 = vector.multi_reduction <add>, %124, %cst_54 [1] : vector<4x8xf32> to vector<4xf32>
    %126 = vector.shape_cast %125 : vector<4xf32> to vector<4x1xf32>
    %127 = tpu.reciprocal %126 {approx = true} : vector<4x1xf32> -> vector<4x1xf32>
    %128 = vector.broadcast %127 : vector<4x1xf32> to vector<4x8xf32>
    %129 = arith.mulf %124, %128 : vector<4x8xf32>
    %130 = arith.truncf %129 : vector<4x8xf32> to vector<4x8xbf16>
    %131 = vector.extract_strided_slice %116 {offsets = [0, 0], sizes = [8, 8], strides = [1, 1]} : vector<8x32xbf16> to vector<8x8xbf16>
    %cst_55 = arith.constant dense<0.000000e+00> : vector<4x8xf32>
    %132 = tpu.matmul %130, %131, %cst_55 {dimension_numbers = #tpu.dot_dimension_numbers<[1], [0], [0], [1], [0, 0, 1, 1], [], []>} : vector<4x8xbf16>, vector<8x8xbf16>, vector<4x8xf32> -> vector<4x8xf32>
    %c0_56 = arith.constant 0 : index
    %c0_57 = arith.constant 0 : index
    %133 = vector.load %arg10[%c0_56, %c0_57] : memref<4x32xf32, #tpu.memory_space<vmem>>, vector<4x8xf32>
    tpu.vector_store %arg10[%c0_56, %c0_57], %132 {strides = array<i32>} : memref<4x32xf32, #tpu.memory_space<vmem>>, vector<4x8xf32>,
    %134 = vector.extract_strided_slice %112 {offsets = [0, 8], sizes = [4, 8], strides = [1, 1]} : vector<4x32xbf16> to vector<4x8xbf16>
    %135 = vector.extract_strided_slice %114 {offsets = [0, 8], sizes = [8, 8], strides = [1, 1]} : vector<8x32xbf16> to vector<8x8xbf16>
    %cst_58 = arith.constant dense<0.000000e+00> : vector<4x8xf32>
    %136 = tpu.matmul %134, %135, %cst_58 {dimension_numbers = #tpu.dot_dimension_numbers<[1], [1], [0], [0], [0, 0, 1, 0], [], []>} : vector<4x8xbf16>, vector<8x8xbf16>, vector<4x8xf32> -> vector<4x8xf32>
    %cst_59 = arith.constant dense<0xFF800000> : vector<4xf32>
    %137 = vector.multi_reduction <maximumf>, %136, %cst_59 [1] : vector<4x8xf32> to vector<4xf32>
    %138 = vector.shape_cast %137 : vector<4xf32> to vector<4x1xf32>
    %139 = vector.broadcast %138 : vector<4x1xf32> to vector<4x8xf32>
    %140 = arith.subf %136, %139 : vector<4x8xf32>
    %141 = math.exp %140 : vector<4x8xf32>
    %cst_60 = arith.constant dense<0.000000e+00> : vector<4xf32>
    %142 = vector.multi_reduction <add>, %141, %cst_60 [1] : vector<4x8xf32> to vector<4xf32>
    %143 = vector.shape_cast %142 : vector<4xf32> to vector<4x1xf32>
    %144 = tpu.reciprocal %143 {approx = true} : vector<4x1xf32> -> vector<4x1xf32>
    %145 = vector.broadcast %144 : vector<4x1xf32> to vector<4x8xf32>
    %146 = arith.mulf %141, %145 : vector<4x8xf32>
    %147 = arith.truncf %146 : vector<4x8xf32> to vector<4x8xbf16>
    %148 = vector.extract_strided_slice %116 {offsets = [0, 8], sizes = [8, 8], strides = [1, 1]} : vector<8x32xbf16> to vector<8x8xbf16>
    %cst_61 = arith.constant dense<0.000000e+00> : vector<4x8xf32>
    %149 = tpu.matmul %147, %148, %cst_61 {dimension_numbers = #tpu.dot_dimension_numbers<[1], [0], [0], [1], [0, 0, 1, 1], [], []>} : vector<4x8xbf16>, vector<8x8xbf16>, vector<4x8xf32> -> vector<4x8xf32>
    %c0_62 = arith.constant 0 : index
    %c8_63 = arith.constant 8 : index
    %150 = vector.load %arg10[%c0_62, %c8_63] : memref<4x32xf32, #tpu.memory_space<vmem>>, vector<4x8xf32>
    tpu.vector_store %arg10[%c0_62, %c8_63], %149 {strides = array<i32>} : memref<4x32xf32, #tpu.memory_space<vmem>>, vector<4x8xf32>,
    %151 = vector.extract_strided_slice %112 {offsets = [0, 16], sizes = [4, 8], strides = [1, 1]} : vector<4x32xbf16> to vector<4x8xbf16>
    %152 = vector.extract_strided_slice %114 {offsets = [0, 16], sizes = [8, 8], strides = [1, 1]} : vector<8x32xbf16> to vector<8x8xbf16>
    %cst_64 = arith.constant dense<0.000000e+00> : vector<4x8xf32>
    %153 = tpu.matmul %151, %152, %cst_64 {dimension_numbers = #tpu.dot_dimension_numbers<[1], [1], [0], [0], [0, 0, 1, 0], [], []>} : vector<4x8xbf16>, vector<8x8xbf16>, vector<4x8xf32> -> vector<4x8xf32>
    %cst_65 = arith.constant dense<0xFF800000> : vector<4xf32>
    %154 = vector.multi_reduction <maximumf>, %153, %cst_65 [1] : vector<4x8xf32> to vector<4xf32>
    %155 = vector.shape_cast %154 : vector<4xf32> to vector<4x1xf32>
    %156 = vector.broadcast %155 : vector<4x1xf32> to vector<4x8xf32>
    %157 = arith.subf %153, %156 : vector<4x8xf32>
    %158 = math.exp %157 : vector<4x8xf32>
    %cst_66 = arith.constant dense<0.000000e+00> : vector<4xf32>
    %159 = vector.multi_reduction <add>, %158, %cst_66 [1] : vector<4x8xf32> to vector<4xf32>
    %160 = vector.shape_cast %159 : vector<4xf32> to vector<4x1xf32>
    %161 = tpu.reciprocal %160 {approx = true} : vector<4x1xf32> -> vector<4x1xf32>
    %162 = vector.broadcast %161 : vector<4x1xf32> to vector<4x8xf32>
    %163 = arith.mulf %158, %162 : vector<4x8xf32>
    %164 = arith.truncf %163 : vector<4x8xf32> to vector<4x8xbf16>
    %165 = vector.extract_strided_slice %116 {offsets = [0, 16], sizes = [8, 8], strides = [1, 1]} : vector<8x32xbf16> to vector<8x8xbf16>
    %cst_67 = arith.constant dense<0.000000e+00> : vector<4x8xf32>
    %166 = tpu.matmul %164, %165, %cst_67 {dimension_numbers = #tpu.dot_dimension_numbers<[1], [0], [0], [1], [0, 0, 1, 1], [], []>} : vector<4x8xbf16>, vector<8x8xbf16>, vector<4x8xf32> -> vector<4x8xf32>
    %c0_68 = arith.constant 0 : index
    %c16_69 = arith.constant 16 : index
    %167 = vector.load %arg10[%c0_68, %c16_69] : memref<4x32xf32, #tpu.memory_space<vmem>>, vector<4x8xf32>
    tpu.vector_store %arg10[%c0_68, %c16_69], %166 {strides = array<i32>} : memref<4x32xf32, #tpu.memory_space<vmem>>, vector<4x8xf32>,
    %168 = vector.extract_strided_slice %112 {offsets = [0, 24], sizes = [4, 8], strides = [1, 1]} : vector<4x32xbf16> to vector<4x8xbf16>
    %169 = vector.extract_strided_slice %114 {offsets = [0, 24], sizes = [8, 8], strides = [1, 1]} : vector<8x32xbf16> to vector<8x8xbf16>
    %cst_70 = arith.constant dense<0.000000e+00> : vector<4x8xf32>
    %170 = tpu.matmul %168, %169, %cst_70 {dimension_numbers = #tpu.dot_dimension_numbers<[1], [1], [0], [0], [0, 0, 1, 0], [], []>} : vector<4x8xbf16>, vector<8x8xbf16>, vector<4x8xf32> -> vector<4x8xf32>
    %cst_71 = arith.constant dense<0xFF800000> : vector<4xf32>
    %171 = vector.multi_reduction <maximumf>, %170, %cst_71 [1] : vector<4x8xf32> to vector<4xf32>
    %172 = vector.shape_cast %171 : vector<4xf32> to vector<4x1xf32>
    %173 = vector.broadcast %172 : vector<4x1xf32> to vector<4x8xf32>
    %174 = arith.subf %170, %173 : vector<4x8xf32>
    %175 = math.exp %174 : vector<4x8xf32>
    %cst_72 = arith.constant dense<0.000000e+00> : vector<4xf32>
    %176 = vector.multi_reduction <add>, %175, %cst_72 [1] : vector<4x8xf32> to vector<4xf32>
    %177 = vector.shape_cast %176 : vector<4xf32> to vector<4x1xf32>
    %178 = tpu.reciprocal %177 {approx = true} : vector<4x1xf32> -> vector<4x1xf32>
    %179 = vector.broadcast %178 : vector<4x1xf32> to vector<4x8xf32>
    %180 = arith.mulf %175, %179 : vector<4x8xf32>
    %181 = arith.truncf %180 : vector<4x8xf32> to vector<4x8xbf16>
    %182 = vector.extract_strided_slice %116 {offsets = [0, 24], sizes = [8, 8], strides = [1, 1]} : vector<8x32xbf16> to vector<8x8xbf16>
    %cst_73 = arith.constant dense<0.000000e+00> : vector<4x8xf32>
    %183 = tpu.matmul %181, %182, %cst_73 {dimension_numbers = #tpu.dot_dimension_numbers<[1], [0], [0], [1], [0, 0, 1, 1], [], []>} : vector<4x8xbf16>, vector<8x8xbf16>, vector<4x8xf32> -> vector<4x8xf32>
    %c0_74 = arith.constant 0 : index
    %c24_75 = arith.constant 24 : index
    %184 = vector.load %arg10[%c0_74, %c24_75] : memref<4x32xf32, #tpu.memory_space<vmem>>, vector<4x8xf32>
    tpu.vector_store %arg10[%c0_74, %c24_75], %183 {strides = array<i32>} : memref<4x32xf32, #tpu.memory_space<vmem>>, vector<4x8xf32>,
    %c0_76 = arith.constant 0 : index
    %c0_77 = arith.constant 0 : index
    %185 = vector.load %arg10[%c0_76, %c0_77] : memref<4x32xf32, #tpu.memory_space<vmem>>, vector<4x32xf32>
    %186 = arith.truncf %185 : vector<4x32xf32> to vector<4x32xbf16>
    %cst_78 = arith.constant dense<0.000000e+00> : vector<4x32xf32>
    %187 = tpu.matmul %186, %2, %cst_78 {dimension_numbers = #tpu.dot_dimension_numbers<[1], [0], [0], [1], [0, 0, 1, 1], [], []>} : vector<4x32xbf16>, vector<32x32xbf16>, vector<4x32xf32> -> vector<4x32xf32>
    %188 = vector.broadcast %5 : vector<1x32xf32> to vector<4x32xf32>
    %189 = arith.addf %187, %188 : vector<4x32xf32>
    %190 = arith.addf %189, %101 : vector<4x32xf32>
    %c0_79 = arith.constant 0 : index
    %c1_80 = arith.constant 1 : index
    %c0_81 = arith.constant 0 : index
    %191 = vector.load %arg9[%c0_79, %c1_80, %c0_81] : memref<4x2x32xf32, #tpu.memory_space<vmem>>, vector<4x1x32xf32>
    %192 = vector.shape_cast %191 : vector<4x1x32xf32> to vector<4x32xf32>
    %193 = vector.shape_cast %190 : vector<4x32xf32> to vector<4x1x32xf32>
    tpu.vector_store %arg9[%c0_79, %c1_80, %c0_81], %193 {strides = array<i32>} : memref<4x2x32xf32, #tpu.memory_space<vmem>>, vector<4x1x32xf32>,
    return
  }
  func.func @transform_0(%arg0: i32) -> (i32, i32, i32) {
    %c0_i32 = arith.constant 0 : i32
    %c0_i32_0 = arith.constant 0 : i32
    %c0_i32_1 = arith.constant 0 : i32
    return %arg0, %c0_i32, %c0_i32_0 : i32, i32, i32
  }
  func.func @transform_1(%arg0: i32) -> (i32, i32, i32) {
    %c0_i32 = arith.constant 0 : i32
    %c0_i32_0 = arith.constant 0 : i32
    %c0_i32_1 = arith.constant 0 : i32
    %c0_i32_2 = arith.constant 0 : i32
    return %c0_i32, %c0_i32_0, %c0_i32_1 : i32, i32, i32
  }
  func.func @transform_2(%arg0: i32) -> (i32, i32) {
    %c0_i32 = arith.constant 0 : i32
    %c0_i32_0 = arith.constant 0 : i32
    %c0_i32_1 = arith.constant 0 : i32
    return %c0_i32, %c0_i32_0 : i32, i32
  }
  func.func @transform_3(%arg0: i32) -> (i32, i32) {
    %c0_i32 = arith.constant 0 : i32
    %c0_i32_0 = arith.constant 0 : i32
    %c0_i32_1 = arith.constant 0 : i32
    return %c0_i32, %c0_i32_0 : i32, i32
  }
  func.func @transform_4(%arg0: i32) -> (i32, i32) {
    %c0_i32 = arith.constant 0 : i32
    %c0_i32_0 = arith.constant 0 : i32
    %c0_i32_1 = arith.constant 0 : i32
    return %c0_i32, %c0_i32_0 : i32, i32
  }
  func.func @transform_5(%arg0: i32) -> (i32, i32) {
    %c0_i32 = arith.constant 0 : i32
    %c0_i32_0 = arith.constant 0 : i32
    %c0_i32_1 = arith.constant 0 : i32
    return %c0_i32, %c0_i32_0 : i32, i32
  }
  func.func @transform_6(%arg0: i32) -> (i32, i32) {
    %c0_i32 = arith.constant 0 : i32
    %c0_i32_0 = arith.constant 0 : i32
    %c0_i32_1 = arith.constant 0 : i32
    return %c0_i32, %c0_i32_0 : i32, i32
  }
  func.func @transform_7(%arg0: i32) -> (i32, i32) {
    %c0_i32 = arith.constant 0 : i32
    %c0_i32_0 = arith.constant 0 : i32
    %c0_i32_1 = arith.constant 0 : i32
    return %c0_i32, %c0_i32_0 : i32, i32
  }
  func.func @transform_8(%arg0: i32) -> (i32, i32, i32) {
    %c0_i32 = arith.constant 0 : i32
    %c0_i32_0 = arith.constant 0 : i32
    %c0_i32_1 = arith.constant 0 : i32
    return %arg0, %c0_i32, %c0_i32_0 : i32, i32, i32
  }
}

</mosaic_0001>

<bundles_post_ra>
// kernel: tpu_custom_call.1
= control target key start
LH: loop header
LB: loop body
LE: loop exit
PB: predicated region body
PF: predicated region fallthrough
CT: control target
= control target key end

     0   :  { %s3213_s0 = inlined_call_operand.hbm [shape: f32[8,2,32], index: 0, kind: input, shape index: {}]   ;;  %s3214_s1 = inlined_call_operand.hbm [shape: f32[8,2,32], index: 1, kind: input, shape index: {}]   ;;  %s3215_s2 = inlined_call_operand.hbm [shape: bf16[32,32], index: 2, kind: input, shape index: {}]   ;;  %s3216_s3 = inlined_call_operand.hbm [shape: bf16[32,64], index: 3, kind: input, shape index: {}]   ;;  %s3217_s4 = inlined_call_operand.hbm [shape: bf16[32,32], index: 4, kind: input, shape index: {}]   ;;  %s3218_s5 = inlined_call_operand.vmem [shape: f32[1,32], index: 5, kind: input, shape index: {}]   ;;  %s3219_s6 = inlined_call_operand.vmem [shape: f32[1,64], index: 6, kind: input, shape index: {}]   ;;  %s3220_s7 = inlined_call_operand.vmem [shape: f32[1,32], index: 7, kind: input, shape index: {}]   ;;  %s3221_s8 = inlined_call_operand.hbm [shape: f32[8,2,32], index: 8, kind: output, shape index: {}]  }
   0x1   :  { %3228 = sst [smem:[#allocation17_spill]] %s3214_s1 }
   0x2   :  { %3229 = sst [smem:[#allocation18_spill]] %s3215_s2 }
   0x3   :  { %13 = vsyncpa [#allocation4], 0 }
   0x4   :  { %15 = vsyncpa [#allocation4 + $0x1], 0 }
   0x5   :  { %16 = vsyncpa [#allocation7], 0 }
   0x6   :  { %17 = vsyncpa [#allocation10], 0 }
   0x7   :  { %18 = vsyncpa [#allocation5], 0 }
   0x8   :  { %20 = vsyncpa [#allocation5 + $0x1], 0  ;;  %s2667_s27 = smov 0   ;;  %s2669_s28 = smov 0  }
   0x9   :  { %s2671_s29 = smov 0   ;;  %s2673_s30 = smov 0  }
   0xa LB: > { %s2688_s9 = sadd.s32 4294967295, %s2595_s30   ;;  %s1998_s10 = sadd.s32 4294967294, %s2595_s30   ;;  %s2595_s30 = sphi %s2673_s30, %s3253_s30   ;;  %s2591_s29 = sphi %s2671_s29, %s3252_s29   ;;  %s2587_s28 = sphi %s2669_s28, %s3251_s28   ;;  %s2583_s27 = sphi %s2667_s27, %s3250_s27  }
   0xb   : > { %p46_p0 = scmp.ne.s32.totalorder %s2587_s28, %s2583_s27  ;;  %p3222_p1 = scmp.eq.s32.totalorder %s2688_s9, 0 }
   0xc   : > { %p223_p3 = scmp.eq.s32.totalorder %s1998_s10, 1  ;;  %p1999_p5 = scmp.ge.s32.totalorder %s2595_s30, 1 }
   0xd   : > { %p2697_p4 = por %p3222_p1, %p46_p0  ;;  %p230_p7 = scmp.lt.s32.totalorder %s2595_s30, 3 }
   0xe   : > { %p2702_p6 = por %p223_p3, %p46_p0  ;;  %s2597_s14 = smov [#allocation6]  }
   0xf   : > { %s3230_s11 = scalar_select %p2697_p4, 1, 0 }
  0x10   : > { %s3231_s12 = scalar_select %p2702_p6, 1, 0 }
  0x11   : > { %p2707_p8 = pnand %p1999_p5, %p230_p7  ;;  %s242_s15 = sshll.u32 %s2597_s14, 4  ;;  %s243_s15 = int_to_ptr.vmem [resolvable:$true] %s242_s15 }
  0x12   : > { %s2598_s17 = smov [#allocation9]   ;;  %s2402_s19 = scalar_lea.vmem %s243_s15, 256 }
  0x13   : > { %s3232_s13 = scalar_select %p2707_p8, 1, 0 }
  0x14   : > { %p2267_p9 = pneg %p2707_p8  ;;  %s268_s18 = sshll.u32 %s2598_s17, 4  ;;  %s269_s18 = int_to_ptr.vmem [resolvable:$true] %s268_s18 }
  0x15   : > { %p2403_p13 = scmp.ne.s32.totalorder %s243_s15, %s2402_s19  ;;  %p2410_p5 = scmp.lt.s32.totalorder %s243_s15, %s243_s15 }
  0x16   : > { %p2716_p11 = pnand %p2267_p9, %p3222_p1  ;;  %p2411_p7 = scmp.lt.s32.totalorder %s2402_s19, %s2402_s19 }
  0x18   : > { %p2393_p12 = pneg %p2716_p11  ;;  %p2412_p10 = por %p2411_p7, %p2410_p5 }
  0x1a   : > { %p2405_p0 = pnand %p2403_p13, %p2393_p12 }
  0x1c   : > { %p2406_p3 = pneg %p2405_p0 }
  0x1e   : > { %p2413_p2 = pnand %p2412_p10, %p2406_p3 }
  0x20   : > { %2416 = shalt.err (!%p2413_p2)
}
  0x21   : > { %s3223_s20 = smov 32   ;;  %s3224_s21 = smov 2  }
  0x22   : > { %s3234_s1 = sld [smem:[#allocation17_spill]]  ;;  %s2601_s24 = smov [#allocation8]  }
  0x23   : > { %s255_s25 = sshll.u32 %s2601_s24, 4  ;;  %s2428_s26 = scalar_lea.vmem %s269_s18, 256  ;;  %s256_s25 = int_to_ptr.vmem [resolvable:$true] %s255_s25 }
  0x24   : > { %p2429_p9 = scmp.ne.s32.totalorder %s269_s18, %s2428_s26  ;;  %p2436_p13 = scmp.lt.s32.totalorder %s269_s18, %s269_s18 }
  0x25   : > { %p2437_p0 = scmp.lt.s32.totalorder %s2428_s26, %s2428_s26 }
  0x26   : > { %p2431_p2 = pnand %p2429_p9, %p2393_p12 }
  0x27   : > { %p2438_p3 = por %p2437_p0, %p2436_p13 }
  0x28   : > { %2270 = dma.hbm_to_vmem [thread:$0]  (!%p2716_p11), %s3234_s1, 256, %s243_s15, [#allocation7], %s3223_s20, %s3223_s20, %s3224_s21  }
  0x29   : > { %p2432_p10 = pneg %p2431_p2 }
  0x2b   : > { %p2439_p5 = pnand %p2438_p3, %p2432_p10 }
  0x2d   : > { %2442 = shalt.err (!%p2439_p5)
}
  0x2e   : > { %s2602_s10 = smov 64   ;;  %s2603_s14 = smov 4  }
  0x2f   : > { %2276 = dma.hbm_to_vmem [thread:$0]  (!%p2716_p11), %s3216_s3, 256, %s269_s18, [#allocation10], %s2602_s10, %s2602_s10, %s2603_s14  }
  0x30   : > { %s2454_s19 = scalar_lea.vmem %s256_s25, 256  ;;  %p2462_p1 = scmp.lt.s32.totalorder %s256_s25, %s256_s25 }
  0x31   : > { %p2455_p7 = scmp.ne.s32.totalorder %s256_s25, %s2454_s19  ;;  %p2463_p13 = scmp.lt.s32.totalorder %s2454_s19, %s2454_s19 }
  0x33   : > { %p2457_p9 = pnand %p2455_p7, %p2393_p12  ;;  %p2464_p10 = por %p2463_p13, %p2462_p1 }
  0x35   : > { %p2458_p2 = pneg %p2457_p9 }
  0x37   : > { %p2465_p0 = pnand %p2464_p10, %p2458_p2 }
  0x39   : > { %2468 = shalt.err (!%p2465_p0)
}
  0x3a   : > { %s3235_s2 = sld [smem:[#allocation18_spill]]  ;;  %s2604_s18 = smov [#allocation11]  }
  0x3b   : > { %s281_s24 = sshll.u32 %s2604_s18, 4  ;;  %s282_s24 = int_to_ptr.vmem [resolvable:$true] %s281_s24 }
  0x3c   : > { %s2480_s26 = scalar_lea.vmem %s282_s24, 256  ;;  %p2488_p9 = scmp.lt.s32.totalorder %s282_s24, %s282_s24 }
  0x3d   : > { %p2481_p3 = scmp.ne.s32.totalorder %s282_s24, %s2480_s26  ;;  %p2489_p1 = scmp.lt.s32.totalorder %s2480_s26, %s2480_s26 }
  0x3f   : > { %p2483_p5 = pnand %p2481_p3, %p2393_p12  ;;  %p2490_p2 = por %p2489_p1, %p2488_p9 }
  0x40   : > { %2273 = dma.hbm_to_vmem [thread:$0]  (!%p2716_p11), %s3235_s2, 256, %s256_s25, [#allocation7], %s2602_s10, %s2602_s10, %s2603_s14  }
  0x41   : > { %p2484_p7 = pneg %p2483_p5 }
  0x43   : > { %p2491_p13 = pnand %p2490_p2, %p2484_p7 }
  0x45   : > { %2494 = shalt.err (!%p2491_p13)
}
  0x46   : > { %2279 = dma.hbm_to_vmem [thread:$0]  (!%p2716_p11), %s3217_s4, 256, %s282_s24, [#allocation10], %s2602_s10, %s2602_s10, %s2603_s14  }
  0x47   : > { %s2758_s25 = sadd.s32 1, %s2595_s30   ;;  %s33_s19 = sadd.s32 1, %s2591_s29 }
  0x48   : > { %s30_s16 = ssub.s32 %s2595_s30, %s2758_s25  ;;  %p40_p12 = scmp.ne.s32.totalorder %s2591_s29, %s2587_s28 }
  0x49   : > { %p31_p10 = scmp.eq.s32.totalorder %s30_s16, 0  ;;  %p41_p0 = scmp.eq.s32.totalorder %s2595_s30, 0 }
  0x4a   : > { %p3236_p3 = scmp.eq.s32.totalorder %s2688_s9, 1  ;;  %p2292_p7 = scmp.lt.s32.totalorder %s2595_s30, 2 }
  0x4b   : > { %s2774_s23 = scalar_select %p31_p10, %s2591_s29, %s33_s19  }
  0x4c   : > { %p2768_p5 = por %p3236_p3, %p40_p12  ;;  %p42_p9 = por %p41_p0, %p40_p12 }
  0x4d   : > { %s304_s18 = sand.u32 1, %s2591_s29   ;;  %s2051_s10 = sshll.u32 %s2595_s30, 7 }
  0x4e   : > { %s3237_s22 = scalar_select %p2768_p5, 1, 0 }
  0x4f   : > { %s2005_s26 = sshll.u32 %s304_s18, 3  ;;  %s2781_s15 = scalar_lea.hbm %s3213_s0, %s2051_s10 }
  0x50   : > { %s308_s17 = scalar_lea.vmem [#allocation3], %s2005_s26  ;;  %p2785_p11 = pnand %p2292_p7, %p42_p9 }
  0x51   : > { %s315_s16 = sshll.u32 %s308_s17, 4  ;;  %s2789_s19 = scalar_lea.sflag [#allocation4], %s304_s18  ;;  %s2783_s16 = int_to_ptr.vmem [resolvable:$true] %s315_s16 }
  0x52   : > { %s2495_s21 = scalar_lea.hbm %s2781_s15, 128  ;;  %p2497_p2 = pneg %p2785_p11 }
  0x53   : > { %p2496_p1 = scmp.ne.s32.totalorder %s2781_s15, %s2495_s21  ;;  %s2500_s26 = scalar_lea.hbm %s3213_s0, 256 }
  0x54   : > { %p2501_p10 = scmp.lt.s32.totalorder %s2781_s15, %s3213_s0  ;;  %p2502_p0 = scmp.lt.s32.totalorder %s2500_s26, %s2495_s21 }
  0x55   : > { %p2498_p13 = pnand %p2497_p2, %p2496_p1 }
  0x56   : > { %p2503_p3 = por %p2502_p0, %p2501_p10 }
  0x57   : > { %p2499_p12 = pneg %p2498_p13 }
  0x59   : > { %p2504_p7 = pnand %p2503_p3, %p2499_p12 }
  0x5b   : > { %2507 = shalt.err (!%p2504_p7)
}
  0x5c   : > { %s2508_s18 = scalar_lea.vmem %s2783_s16, 128  ;;  %s2605_s1 = smov [#allocation3]  }
  0x5d   : > { %p2509_p9 = scmp.ne.s32.totalorder %s2783_s16, %s2508_s18  ;;  %s2513_s2 = sshll.u32 %s2605_s1, 4  ;;  %s2514_s2 = int_to_ptr.vmem [resolvable:$false] %s2513_s2 }
  0x5e   : > { %s2515_s10 = scalar_lea.vmem %s2514_s2, 256  ;;  %p2516_p13 = scmp.lt.s32.totalorder %s2783_s16, %s2514_s2 }
  0x5f   : > { %p2511_p6 = pnand %p2509_p9, %p2497_p2  ;;  %p2517_p5 = scmp.lt.s32.totalorder %s2515_s10, %s2508_s18 }
  0x61   : > { %p2512_p1 = pneg %p2511_p6  ;;  %p2518_p4 = por %p2517_p5, %p2516_p13 }
  0x63   : > { %p2519_p8 = pnand %p2518_p4, %p2512_p1 }
  0x65   : > { %2522 = shalt.err (!%p2519_p8)
}
  0x66   : > { %s3239_s21 = smov 2   ;;  %s3240_s14 = smov 32  }
  0x67   : > { %2283 = dma.hbm_to_vmem [thread:$0]  (!%p2785_p11), %s2781_s15, 128, %s2783_s16, %s2789_s19, %s3240_s14, %s3240_s14, %s3239_s21  }
  0x68   : > { %p3241_p6 = scmp.ne.s32.totalorder %s3232_s13, 0 }
  0x69   : > { %s2816_s1 = sand.u32 (!%p3241_p6), 1, %s2587_s28   ;;  %p3242_p4 = scmp.ne.s32.totalorder (!%p3241_p6), %s3230_s11, 0 }
  0x6a   : > { %327 = sbr.rel (%p3241_p6) target bundleno = 2729 (0xaa9), region = 52  ;;  %s2009_s2 = sshll.u32 (!%p3241_p6), %s2816_s1, 3 }
  0x6b   : > { %s330_s26 = scalar_lea.sflag (!%p3241_p6), [#allocation4], %s2816_s1  ;;  %s2822_s20 = scalar_lea.vmem (!%p3241_p6), [#allocation3], %s2009_s2 }
  0x6f   : > { %2566 = dma.done.wait (%p3242_p4), %s330_s26, 128  }
  0x70   : > { %2568 = vsyncadd (%p3242_p4), %s330_s26, 4294967168  ;;  %p3243_p8 = scmp.eq.s32.totalorder %s2688_s9, 0 }
  0x72   : > { %2570 = dma.done.wait (%p3243_p8), [#allocation7], 512   ;;  %p3244_p5 = pmov %p3243_p8 }
  0x74   : > { %2572 = vsyncadd (%p3244_p5), [#allocation7], 4294966784  ;;  %p3245_p11 = pmov %p3244_p5 }
  0x75   : > { %p3246_p2 = pmov %p3244_p5 }
  0x76   : > { %2574 = dma.done.wait (%p3245_p11), [#allocation10], 512  }
  0x77   : > { %2576 = vsyncadd (%p3246_p2), [#allocation10], 4294966784  ;;  %v2606_v0 = vmov 0.0   ;;  %vm2607_vm0 = vmmov 0   ;;  %v2842_v1 = vld [vmem:[#allocation9 + $0x8] sm:$0xff]   ;;  %vm431_vm1 = vcmask 1041409  }
  0x78   : > { %2111 = vmatprep.subr.bf16.mxu1 %v2606_v0  ;;  %2103 = vmatprep.subr.bf16.mxu0 %v2606_v0  ;;  %v2844_v2 = vld [vmem:[#allocation8 + $0x8] sm:$0xff]   ;;  %vm434_vm2 = vcmask 1042434   ;;  %v2847_v3 = vld [vmem:[#allocation9] sm:$0xff]   ;;  %vm437_vm3 = vcmask 1043459   ;;  %v2851_v4 = vld [vmem:[#allocation8] sm:$0xff]   ;;  %vm533_vm4 = vcmask 1044484  }
  0x79   : > { %2115 = vmatprep.mubr.msk.bf16.mxu1 %vm2607_vm0, %v2606_v0  ;;  %2107 = vmatprep.mubr.msk.bf16.mxu0 %vm2607_vm0, %v2606_v0  ;;  %v404_v5 = vld [vmem:[#allocation6] sm:$0x1]  ;;  %v405_v6 = vld [vmem:[#allocation6 + $0x2] sm:$0x1]  ;;  %v406_v7 = vld [vmem:[#allocation6 + $0x4] sm:$0x1] }
  0x7a   : > { %2112 = vmatpush3.bf16.msra.mxu1 %v2842_v1  ;;  %2104 = vmatpush3.bf16.msra.mxu0 %v2844_v2  ;;  %v407_v8 = vld [vmem:[#allocation6 + $0x6] sm:$0x1]  ;;  %v408_v9 = vld [vmem:[#allocation6 + $0x8] sm:$0x1]  ;;  %v409_v10 = vld [vmem:[#allocation6 + $0xa] sm:$0x1]  ;;  %v496_v11 = vpack.c.bf16 %v404_v5, %v404_v5  ;;  %v497_v12 = vpack.c.bf16 %v405_v6, %v405_v6  ;;  %v498_v13 = vpack.c.bf16 %v406_v7, %v406_v7 }
  0x7b   : > { %2113 = vmatprep.subr.bf16.mxu1 %v2606_v0  ;;  %2105 = vmatprep.subr.bf16.mxu0 %v2606_v0  ;;  %v410_v14 = vld [vmem:[#allocation6 + $0xc] sm:$0x1]  ;;  %v411_v15 = vld [vmem:[#allocation6 + $0xe] sm:$0x1]  ;;  %v499_v16 = vpack.c.bf16 %v407_v8, %v407_v8  ;;  %v500_v17 = vpack.c.bf16 %v408_v9, %v408_v9  ;;  %v501_v18 = vpack.c.bf16 %v409_v10, %v409_v10  ;;  %v2856_v19 = vld [vmem:[%s2822_s20] sm:$0x1] }
  0x7c   : > { %v502_v20 = vpack.c.bf16 %v410_v14, %v410_v14  ;;  %v503_v21 = vpack.c.bf16 %v411_v15, %v411_v15  ;;  %v518_v22 = vunpack.c.l.b16 %v496_v11  ;;  %v519_v23 = vunpack.c.l.b16 %v497_v12  ;;  %v2860_v24 = vld [vmem:[%s2822_s20 + $0x2] sm:$0x1]  ;;  %v2863_v25 = vld [vmem:[%s2822_s20 + $0x4] sm:$0x1]  ;;  %v2867_v30 = vld [vmem:[%s2822_s20 + $0x6] sm:$0x1] }
  0x7d   : > { %v520_v26 = vunpack.c.l.b16 %v498_v13  ;;  %v521_v27 = vunpack.c.l.b16 %v499_v16  ;;  %v522_v28 = vunpack.c.l.b16 %v500_v17  ;;  %v523_v29 = vunpack.c.l.b16 %v501_v18  ;;  %v2897_v63 = vld [vmem:[%s3219_s6] ss:$0 sm:$0xff]  ;;  %s2608_s19 = smov 112   ;;  %s2609_s24 = smov 120  }
  0x7e   : > { %2114 = vmatpush3.bf16.msra.mxu1 %v2847_v3  ;;  %2106 = vmatpush3.bf16.msra.mxu0 %v2851_v4  ;;  %v524_v31 = vunpack.c.l.b16 %v502_v20  ;;  %v525_v32 = vunpack.c.l.b16 %v503_v21  ;;  %v526_v33 = vrot.slane %v519_v23, 7  ;;  %v412_v34 = vpack.c.bf16 %v2856_v19, %v2856_v19  ;;  %v2902_v6 = vld [vmem:[%s3218_s5] ss:$0 sm:$0xff]  ;;  %s2610_s17 = smov 104   ;;  %s2611_s18 = smov 96  }
  0x7f   : > { %2125 = vmatprep.subr.bf16.mxu1 %v2606_v0  ;;  %2119 = vmatprep.subr.bf16.mxu0 %v2606_v0  ;;  %v528_v35 = vrot.slane %v520_v26, 6  ;;  %v530_v36 = vrot.slane %v521_v27, 5  ;;  %v532_v37 = vrot.slane %v522_v28, 4  ;;  %vm536_vm5 = vcmask 1045509   ;;  %s2612_s10 = smov 80   ;;  %s2613_s21 = smov 72  }
  0x80   : > { %v527_v38 = vsel %vm431_vm1, %v526_v33, %v518_v22  ;;  %v535_v39 = vrot.slane %v523_v29, 3  ;;  %vm539_vm6 = vcmask 1046534   ;;  %v413_v40 = vpack.c.bf16 %v2860_v24, %v2860_v24  ;;  %s2614_s14 = smov 88   ;;  %s2615_s26 = smov 8  }
  0x81   : > { %v529_v41 = vsel %vm434_vm2, %v528_v35, %v527_v38  ;;  %v538_v42 = vrot.slane %v524_v31, 2  ;;  %v414_v43 = vpack.c.bf16 %v2863_v25, %v2863_v25  ;;  %v415_v44 = vpack.c.bf16 %v2867_v30, %v2867_v30  ;;  %s2616_s11 = smov 16   ;;  %s2617_s13 = smov 24  }
  0x82   : > { %v531_v45 = vsel %vm437_vm3, %v530_v36, %v529_v41  ;;  %v541_v46 = vrot.slane %v525_v32, 1  ;;  %v426_v47 = vunpack.c.l.b16 %v412_v34  ;;  %v427_v48 = vunpack.c.l.b16 %v413_v40  ;;  %s3060_s16 = scalar_lea.vmem [#allocation12], %s2009_s2  ;;  %s2052_s2 = sshll.u32 %s2688_s9, 7 }
  0x83   : > { %v534_v49 = vsel %vm533_vm4, %v532_v37, %v531_v45  ;;  %vm542_vm7 = vcmask 1047559   ;;  %v428_v50 = vunpack.c.l.b16 %v414_v43  ;;  %v429_v51 = vunpack.c.l.b16 %v415_v44  ;;  %s1874_s9 = scalar_lea.sflag [#allocation5], %s2816_s1  ;;  %p3247_p10 = scmp.ne.s32.totalorder %s3237_s22, 0 }
  0x84   : > { %v537_v52 = vsel %vm536_vm5, %v535_v39, %v534_v49  ;;  %v430_v53 = vrot.slane %v427_v48, 7  ;;  %vm452_vm8 = vcmask 261120   ;;  %vm602_vm9 = vcmask 64512  }
  0x85   : > { %v540_v54 = vsel %vm539_vm6, %v538_v42, %v537_v52  ;;  %v433_v55 = vrot.slane %v428_v50, 6  ;;  %v436_v56 = vrot.slane %v429_v51, 5  ;;  %vm649_vm10 = vcmask 60416  }
  0x86   : > { %v543_v57 = vsel %vm542_vm7, %v541_v46, %v540_v54  ;;  %v432_v58 = vsel %vm431_vm1, %v430_v53, %v426_v47  ;;  %vm668_vm11 = vcmask 1043456   ;;  %vm828_vm12 = vcmask 126016  }
  0x87   : > { %v544_v59 = vpack.c.b16 %v543_v57, %v543_v57  ;;  %v435_v60 = vsel %vm434_vm2, %v433_v55, %v432_v58  ;;  %vm944_vm13 = vcmask 191616   ;;  %vm1060_vm14 = vcmask 257216  }
  0x88   : > { %v438_v61 = vsel %vm437_vm3, %v436_v56, %v435_v60  ;;  %vm1166_vm15 = vcmask 253952  }
  0x89   : > { %2116 = vmatmul.mubr.msk.bf16.vlgmr.msra.gmra.mxu1 %vm452_vm8, %v544_v59  ;;  %v439_v62 = vpack.c.b16 %v438_v61, %v438_v61 }
  0x8a   : > { %2127 = vmatprep.mubr.msk.bf16.mxu1 %vm2607_vm0, %v2606_v0 }
  0x8b   : > { %2108 = vmatmul.mubr.msk.bf16.vlgmr.msra.gmra.mxu0 %vm452_vm8, %v439_v62 }
  0x8c   : > { %2121 = vmatprep.mubr.msk.bf16.mxu0 %vm2607_vm0, %v2606_v0 }
 0x149   : > { %v594_v5 = vpop.f32.mrf.mxu1 }
 0x14a   : > { %v595_v7 = vadd.f32 %v2897_v63, %v594_v5 }
 0x14b   : > { %v490_v8 = vpop.f32.mrf.mxu0  ;;  %v2117_v9 = vpop.f32.mrf.mxu1 }
 0x14c   : > { %v2905_v10 = vpack.c.bf16 %v595_v7, %v595_v7  ;;  %v491_v11 = vadd.f32 %v2902_v6, %v490_v8 }
 0x14d   : > { %v2109_v12 = vpop.f32.mrf.mxu0  ;;  %v597_v13 = vpop.f32.mrf.mxu1 }
 0x14e   : > { %v600_v14 = vpack.c.bf16 %v491_v11, %v491_v11  ;;  %832 = vrot.lane.b32.xlu1 %v2905_v10, %s2608_s19  ;;  %716 = vrot.lane.b32.xlu0 %v2905_v10, %s2609_s24  ;;  %v607_v15 = vsel %vm602_vm9, %v2905_v10, 0 }
 0x14f   : > { %v493_v16 = vpop.f32.mrf.mxu0  ;;  %v2118_v17 = vpop.f32.mrf.mxu1  ;;  %2120 = vmatpush3.bf16.xpose.msra.mxu0 %v607_v15 }
 0x150   : > { %2131 = vmatprep.subr.bf16.mxu0 %v2606_v0 }
 0x151   : > { %v2110_v18 = vpop.f32.mrf.mxu0 }
 0x152   : > { %830 = vrot.lane.b32.xlu1 %v600_v14, %s2608_s19  ;;  %714 = vrot.lane.b32.xlu0 %v600_v14, %s2609_s24 }
 0x156   : > { %946 = vrot.lane.b32.xlu1 %v600_v14, %s2610_s17  ;;  %948 = vrot.lane.b32.xlu0 %v2905_v10, %s2610_s17 }
 0x157   : > { %2122 = vmatmul.mubr.msk.bf16.vlgmr.msra.gmra.mxu0 %vm602_vm9, %v600_v14 }
 0x158   : > { %2133 = vmatprep.mubr.msk.bf16.mxu0 %vm2607_vm0, %v2606_v0 }
 0x1c0   : > { %v717_v20 = vpop.permute.xlu0 %716  ;;  %v833_v22 = vpop.permute.xlu1 %832 }
 0x1c1   : > { %v722_v21 = vsel %vm602_vm9, %v717_v20, 0  ;;  %v838_v26 = vsel %vm602_vm9, %v833_v22, 0 }
 0x1c2   : > { %2132 = vmatpush3.bf16.xpose.msra.mxu0 %v722_v21 }
 0x1c3   : > { %2143 = vmatprep.subr.bf16.mxu0 %v2606_v0 }
 0x1c4   : > { %v715_v23 = vpop.permute.xlu0 %714  ;;  %v831_v28 = vpop.permute.xlu1 %830 }
 0x1c8   : > { %v949_v27 = vpop.permute.xlu0 %948  ;;  %v947_v31 = vpop.permute.xlu1 %946 }
 0x1c9   : > { %2134 = vmatmul.mubr.msk.bf16.vlgmr.msra.gmra.mxu0 %vm602_vm9, %v715_v23  ;;  %v954_v29 = vsel %vm602_vm9, %v949_v27, 0 }
 0x1ca   : > { %2144 = vmatpush3.bf16.xpose.msra.mxu0 %v838_v26  ;;  %2145 = vmatprep.mubr.msk.bf16.mxu0 %vm2607_vm0, %v2606_v0 }
 0x1cb   : > { %2155 = vmatprep.subr.bf16.mxu0 %v2606_v0 }
 0x1d1   : > { %2146 = vmatmul.mubr.msk.bf16.vlgmr.msra.gmra.mxu0 %vm602_vm9, %v831_v28 }
 0x1d2   : > { %2156 = vmatpush3.bf16.xpose.msra.mxu0 %v954_v29  ;;  %2157 = vmatprep.mubr.msk.bf16.mxu0 %vm2607_vm0, %v2606_v0 }
 0x1d3   : > { %2167 = vmatprep.subr.bf16.mxu0 %v2606_v0 }
 0x1d9   : > { %2158 = vmatmul.mubr.msk.bf16.vlgmr.msra.gmra.mxu0 %vm602_vm9, %v947_v31 }
 0x1da   : > { %2171 = vmatprep.mubr.msk.bf16.mxu0 %vm2607_vm0, %v2606_v0 }
 0x217   : > { %v643_v32 = vpop.f32.mrf.mxu0 }
 0x218   : > { %v650_v33 = vsel %vm649_vm10, %v643_v32, -inf }
 0x219   : > { %651 = vmax.xlane.f32.xlu0 %v650_v33  ;;  %v2123_v34 = vpop.f32.mrf.mxu0 }
 0x21b   : > { %v646_v35 = vpop.f32.mrf.mxu0 }
 0x21d   : > { %v2124_v36 = vpop.f32.mrf.mxu0 }
 0x289   : > { %v758_v37 = vpop.f32.mrf.mxu0 }
 0x28a   : > { %v764_v38 = vsel %vm649_vm10, %v758_v37, -inf }
 0x28b   : > { %765 = vmax.xlane.f32.xlu1 %v764_v38  ;;  %v2135_v39 = vpop.f32.mrf.mxu0 }
 0x28d   : > { %v761_v40 = vpop.f32.mrf.mxu0 }
 0x28f   : > { %v2136_v41 = vpop.f32.mrf.mxu0 }
 0x291   : > { %v874_v42 = vpop.f32.mrf.mxu0 }
 0x292   : > { %v880_v43 = vsel %vm649_vm10, %v874_v42, -inf }
 0x293   : > { %881 = vmax.xlane.f32.xlu0 %v880_v43  ;;  %v2147_v44 = vpop.f32.mrf.mxu0 }
 0x295   : > { %v877_v45 = vpop.f32.mrf.mxu0 }
 0x297   : > { %v2148_v46 = vpop.f32.mrf.mxu0 }
 0x299   : > { %v990_v47 = vpop.f32.mrf.mxu0 }
 0x29a   : > { %v996_v48 = vsel %vm649_vm10, %v990_v47, -inf }
 0x29b   : > { %997 = vmax.xlane.f32.xlu0 %v996_v48  ;;  %v2159_v49 = vpop.f32.mrf.mxu0 }
 0x29c   : > { %v2980_v49 = vld [vmem:[#allocation11 + $0x8] sm:$0xff]  }
 0x29d   : > { %v993_v50 = vpop.f32.mrf.mxu0  ;;  %2168 = vmatpush3.bf16.msra.mxu0 %v2980_v49 }
 0x29e   : > { %v2983_v50 = vld [vmem:[#allocation11] sm:$0xff]   ;;  %2169 = vmatprep.subr.bf16.mxu0 %v2606_v0 }
 0x29f   : > { %v2160_v51 = vpop.f32.mrf.mxu0 }
 0x2a1   : > { %2170 = vmatpush3.bf16.msra.mxu0 %v2983_v50 }
 0x2a2   : > { %v652_v52 = vpop.xlane.xlu0 %651  ;;  %2183 = vmatprep.subr.bf16.mxu0 %v2606_v0 }
 0x2a3   : > { %v653_v53 = vsub.f32 %v643_v32, %v652_v52 }
 0x2a5   : > { %v654_v54 = vmul.f32 1.442695, %v653_v53  ;;  %v2990_v53 = vld [vmem:[%s2822_s20 + $0x3] sm:$0x1] }
 0x2a7   : > { %2359 = vpow2.f32 %v654_v54 }
 0x2b4   : > { %v2360_v55 = vpop.eup %2359 }
 0x2b5   : > { %v656_v56 = vsel %vm649_vm10, %v2360_v55, 0.0 }
 0x2b6   : > { %657 = vadd.xlane.f32.xlu1 %v656_v56  ;;  %v2996_v56 = vld [vmem:[%s2822_s20 + $0x5] sm:$0x1] }
 0x2c7   : > { %663 = vrot.lane.b32.xlu1 %v2905_v10, %s2611_s18 }
 0x314   : > { %v766_v57 = vpop.xlane.xlu1 %765 }
 0x315   : > { %v767_v58 = vsub.f32 %v758_v37, %v766_v57 }
 0x317   : > { %v768_v59 = vmul.f32 1.442695, %v767_v58  ;;  %v2999_v58 = vld [vmem:[%s2822_s20 + $0x7] sm:$0x1] }
 0x319   : > { %2361 = vpow2.f32 %v768_v59  ;;  %v1184_v59 = vpack.c.bf16 %v2990_v53, %v2990_v53 }
 0x31c   : > { %v882_v60 = vpop.xlane.xlu0 %881 }
 0x31d   : > { %v883_v61 = vsub.f32 %v874_v42, %v882_v60 }
 0x31f   : > { %v884_v62 = vmul.f32 1.442695, %v883_v61 }
 0x321   : > { %2363 = vpow2.f32 %v884_v62  ;;  %v1185_v62 = vpack.c.bf16 %v2996_v56, %v2996_v56 }
 0x324   : > { %v998_v5 = vpop.xlane.xlu0 %997 }
 0x325   : > { %v999_v7 = vsub.f32 %v990_v47, %v998_v5  ;;  %v1186_v5 = vpack.c.bf16 %v2999_v58, %v2999_v58 }
 0x326   : > { %v2362_v8 = vpop.eup %2361 }
 0x327   : > { %v1000_v9 = vmul.f32 1.442695, %v999_v7  ;;  %v770_v11 = vsel %vm649_vm10, %v2362_v8, 0.0 }
 0x328   : > { %771 = vadd.xlane.f32.xlu0 %v770_v11  ;;  %v1193_v11 = vunpack.c.l.b16 %v1185_v62 }
 0x329   : > { %2365 = vpow2.f32 %v1000_v9  ;;  %v1192_v9 = vunpack.c.l.b16 %v1184_v59 }
 0x32e   : > { %v2364_v12 = vpop.eup %2363 }
 0x32f   : > { %v886_v13 = vsel %vm649_vm10, %v2364_v12, 0.0 }
 0x330   : > { %887 = vadd.xlane.f32.xlu1 %v886_v13 }
 0x336   : > { %v2366_v14 = vpop.eup %2365 }
 0x337   : > { %v1002_v15 = vsel %vm649_vm10, %v2366_v14, 0.0 }
 0x338   : > { %1003 = vadd.xlane.f32.xlu0 %v1002_v15  ;;  %v1197_v15 = vrot.slane %v1193_v11, 6 }
 0x33f   : > { %v658_v16 = vpop.xlane.xlu1 %657 }
 0x340   : > { %2367 = vrcp.f32 %v658_v16 }
 0x341   : > { %892 = vrot.lane.b32.xlu1 %v2905_v10, %s2612_s10 }
 0x343   : > { %v664_v17 = vpop.permute.xlu1 %663 }
 0x344   : > { %v670_v18 = vsel %vm668_vm11, %v664_v17, 0 }
 0x345   : > { %2126 = vmatpush3.bf16.msra.mxu1 %v670_v18  ;;  %1008 = vrot.lane.b32.xlu1 %v2905_v10, %s2613_s21 }
 0x346   : > { %2137 = vmatprep.subr.bf16.mxu1 %v2606_v0 }
 0x34d   : > { %v2368_v20 = vpop.eup %2367 }
 0x34e   : > { %776 = vrot.lane.b32.xlu0 %v2905_v10, %s2614_s14  ;;  %v660_v21 = vmul.f32 %v2368_v20, %v2360_v55  ;;  %v2993_v55 = vld [vmem:[%s2822_s20 + $0x1] sm:$0x1] }
 0x34f   : > { %v1183_v60 = vpack.c.bf16 %v2993_v55, %v2993_v55 }
 0x350   : > { %v661_v22 = vpack.c.bf16 %v660_v21, %v660_v21 }
 0x352   : > { %2128 = vmatmul.mubr.msk.bf16.vlgmr.msra.gmra.mxu1 %vm602_vm9, %v661_v22 }
 0x353   : > { %2139 = vmatprep.mubr.msk.bf16.mxu1 %vm2607_vm0, %v2606_v0 }
 0x3b1   : > { %v772_v23 = vpop.xlane.xlu0 %771 }
 0x3b2   : > { %2369 = vrcp.f32 %v772_v23  ;;  %v1176_v23 = vld [vmem:[#allocation6 + $0x3] sm:$0x1] }
 0x3b9   : > { %v888_v26 = vpop.xlane.xlu1 %887 }
 0x3ba   : > { %2371 = vrcp.f32 %v888_v26  ;;  %v1177_v26 = vld [vmem:[#allocation6 + $0x5] sm:$0x1] }
 0x3bd   : > { %v893_v33 = vpop.permute.xlu1 %892 }
 0x3be   : > { %v898_v35 = vsel %vm668_vm11, %v893_v33, 0 }
 0x3bf   : > { %v2370_v27 = vpop.eup %2369 }
 0x3c0   : > { %v774_v29 = vmul.f32 %v2370_v27, %v2362_v8  ;;  %v1191_v8 = vunpack.c.l.b16 %v1183_v60  ;;  %v1246_v27 = vpack.c.bf16 %v1176_v23, %v1176_v23  ;;  %v1131_v23 = vrot.slane %v2863_v25, 6 }
 0x3c1   : > { %v1004_v28 = vpop.xlane.xlu0 %1003  ;;  %v1009_v37 = vpop.permute.xlu1 %1008 }
 0x3c2   : > { %2373 = vrcp.f32 %v1004_v28  ;;  %v775_v10 = vpack.c.bf16 %v774_v29, %v774_v29  ;;  %v1014_v40 = vsel %vm668_vm11, %v1009_v37, 0  ;;  %v1175_v28 = vld [vmem:[#allocation6 + $0x1] sm:$0x1] }
 0x3c3   : > { %v1245_v33 = vpack.c.bf16 %v1175_v28, %v1175_v28  ;;  %v1141_v28 = vlaneseq }
 0x3c5   : > { %v777_v31 = vpop.permute.xlu0 %776  ;;  %v1261_v37 = vunpack.c.l.b16 %v1245_v33  ;;  %v1142_v33 = vshrl.u32 %v1141_v28, 7 }
 0x3c6   : > { %v782_v32 = vsel %vm668_vm11, %v777_v31, 0  ;;  %v1178_v31 = vld [vmem:[#allocation6 + $0x7] sm:$0x1] }
 0x3c7   : > { %2138 = vmatpush3.bf16.msra.mxu1 %v782_v32  ;;  %v2372_v34 = vpop.eup %2371  ;;  %v1247_v32 = vpack.c.bf16 %v1177_v26, %v1177_v26  ;;  %v2618_v26 = vmov 1966171168  }
 0x3c8   : > { %2149 = vmatprep.subr.bf16.mxu1 %v2606_v0  ;;  %v890_v36 = vmul.f32 %v2372_v34, %v2364_v12  ;;  %v1194_v12 = vunpack.c.l.b16 %v1186_v5  ;;  %v1179_v34 = vld [vmem:[#allocation6 + $0x9] sm:$0x1] }
 0x3ca   : > { %2140 = vmatmul.mubr.msk.bf16.vlgmr.msra.gmra.mxu1 %vm602_vm9, %v775_v10  ;;  %v891_v38 = vpack.c.bf16 %v890_v36, %v890_v36  ;;  %v1199_v16 = vrot.slane %v1194_v12, 5  ;;  %v1262_v10 = vunpack.c.l.b16 %v1246_v27  ;;  %v1263_v36 = vunpack.c.l.b16 %v1247_v32 }
 0x3cb   : > { %2150 = vmatpush3.bf16.msra.mxu1 %v898_v35  ;;  %2151 = vmatprep.mubr.msk.bf16.mxu1 %vm2607_vm0, %v2606_v0  ;;  %v1248_v35 = vpack.c.bf16 %v1178_v31, %v1178_v31  ;;  %v1139_v27 = vunpack.c.l.s4 %v2618_v26 }
 0x3cc   : > { %2161 = vmatprep.subr.bf16.mxu1 %v2606_v0 }
 0x3cd   : > { %v1140_v32 = vunpack.c.0.s8 %v1139_v27 }
 0x3cf   : > { %v2374_v39 = vpop.eup %2373 }
 0x3d0   : > { %v1006_v41 = vmul.f32 %v2374_v39, %v2366_v14  ;;  %v1195_v14 = vrot.slane %v1192_v9, 7  ;;  %v1180_v39 = vld [vmem:[#allocation6 + $0xb] sm:$0x1] }
 0x3d2   : > { %2152 = vmatmul.mubr.msk.bf16.vlgmr.msra.gmra.mxu1 %vm602_vm9, %v891_v38  ;;  %v1007_v42 = vpack.c.bf16 %v1006_v41, %v1006_v41  ;;  %v1196_v18 = vsel %vm431_vm1, %v1195_v14, %v1191_v8  ;;  %v1269_v38 = vrot.slane %v1262_v10, 7  ;;  %v3049_v10 = vld [vmem:[%s3220_s7] ss:$0 sm:$0xff] }
 0x3d3   : > { %2162 = vmatpush3.bf16.msra.mxu1 %v1014_v40  ;;  %2163 = vmatprep.mubr.msk.bf16.mxu1 %vm2607_vm0, %v2606_v0  ;;  %v1198_v20 = vsel %vm434_vm2, %v1197_v15, %v1196_v18  ;;  %v1249_v40 = vpack.c.bf16 %v1179_v34, %v1179_v34 }
 0x3d4   : > { %2175 = vmatprep.subr.bf16.mxu1 %v2606_v0  ;;  %v1200_v21 = vsel %vm437_vm3, %v1199_v16, %v1198_v20 }
 0x3d5   : > { %v1201_v22 = vpack.c.b16 %v1200_v21, %v1200_v21 }
 0x3da   : > { %2164 = vmatmul.mubr.msk.bf16.vlgmr.msra.gmra.mxu1 %vm602_vm9, %v1007_v42  ;;  %v1264_v42 = vunpack.c.l.b16 %v1248_v35  ;;  %v3053_v35 = vsub.s32 %v1140_v32, %v1142_v33 }
 0x3db   : > { %2176 = vmatpush3.bf16.msra.mxu1 %v2844_v2  ;;  %2179 = vmatprep.mubr.msk.bf16.mxu1 %vm2607_vm0, %v2606_v0 }
 0x3dc   : > { %2177 = vmatprep.subr.bf16.mxu1 %v2606_v0 }
 0x3df   : > { %2178 = vmatpush3.bf16.msra.mxu1 %v2851_v4 }
 0x3e0   : > { %2191 = vmatprep.subr.bf16.mxu1 %v2606_v0 }
 0x3e2   : > { %2180 = vmatmul.mubr.msk.bf16.vlgmr.msra.gmra.mxu1 %vm452_vm8, %v1201_v22 }
 0x3e3   : > { %2193 = vmatprep.mubr.msk.bf16.mxu1 %vm2607_vm0, %v2606_v0 }
 0x412   : > { %v706_v43 = vpop.f32.mrf.mxu1 }
 0x413   : > { %712 = vst.msk [vmem:[#allocation2] sm:$0xf] %vm649_vm10, %v706_v43  ;;  %v1271_v43 = vrot.slane %v1263_v36, 6 }
 0x414   : > { %v2129_v44 = vpop.f32.mrf.mxu1 }
 0x415   : > { %v1181_v44 = vld [vmem:[#allocation6 + $0xd] sm:$0x1] }
 0x416   : > { %v709_v45 = vpop.f32.mrf.mxu1 }
 0x417   : > { %v1250_v45 = vpack.c.bf16 %v1180_v39, %v1180_v39 }
 0x418   : > { %v2130_v46 = vpop.f32.mrf.mxu1 }
 0x419   : > { %v1270_v46 = vsel %vm431_vm1, %v1269_v38, %v1261_v37 }
 0x48a   : > { %v818_v47 = vpop.f32.mrf.mxu1 }
 0x48b   : > { %825 = vrot.lane.b32.xlu0 %v818_v47, %s2615_s26  ;;  %v1265_v47 = vunpack.c.l.b16 %v1249_v40 }
 0x48c   : > { %v2141_v2 = vpop.f32.mrf.mxu1 }
 0x48d   : > { %v1273_v2 = vrot.slane %v1264_v42, 5 }
 0x48e   : > { %v821_v48 = vpop.f32.mrf.mxu1 }
 0x48f   : > { %v1182_v48 = vld [vmem:[#allocation6 + $0xf] sm:$0x1] }
 0x490   : > { %v2142_v4 = vpop.f32.mrf.mxu1  ;;  %v1252_v59 = vpack.c.bf16 %v1182_v48, %v1182_v48 }
 0x491   : > { %v1251_v4 = vpack.c.bf16 %v1181_v44, %v1181_v44 }
 0x492   : > { %v934_v51 = vpop.f32.mrf.mxu1 }
 0x493   : > { %941 = vrot.lane.b32.xlu1 %v934_v51, %s2616_s11  ;;  %v1272_v51 = vsel %vm434_vm2, %v1271_v43, %v1270_v46 }
 0x494   : > { %v2153_v52 = vpop.f32.mrf.mxu1  ;;  %v1274_v60 = vsel %vm437_vm3, %v1273_v2, %v1272_v51 }
 0x495   : > { %v1266_v52 = vunpack.c.l.b16 %v1250_v45 }
 0x496   : > { %v937_v54 = vpop.f32.mrf.mxu1 }
 0x497   : > { %v1275_v54 = vrot.slane %v1265_v47, 4  ;;  %v1277_v62 = vrot.slane %v1266_v52, 3 }
 0x498   : > { %v2154_v57 = vpop.f32.mrf.mxu1 }
 0x499   : > { %v1276_v5 = vsel %vm533_vm4, %v1275_v54, %v1274_v60 }
 0x49a   : > { %v1050_v61 = vpop.f32.mrf.mxu1  ;;  %v1278_v9 = vsel %vm536_vm5, %v1277_v62, %v1276_v5 }
 0x49b   : > { %1057 = vrot.lane.b32.xlu0 %v1050_v61, %s2617_s13  ;;  %v1267_v61 = vunpack.c.l.b16 %v1251_v4 }
 0x49c   : > { %v2165_v7 = vpop.f32.mrf.mxu1 }
 0x49d   : > { %v1268_v7 = vunpack.c.l.b16 %v1252_v59  ;;  %v1279_v8 = vrot.slane %v1267_v61, 2 }
 0x49e   : > { %v1053_v13 = vpop.f32.mrf.mxu1 }
 0x49f   : > { %v1281_v12 = vrot.slane %v1268_v7, 1  ;;  %v1280_v14 = vsel %vm539_vm6, %v1279_v8, %v1278_v9 }
 0x4a0   : > { %v2166_v17 = vpop.f32.mrf.mxu1 }
 0x4a1   : > { %v1282_v15 = vsel %vm542_vm7, %v1281_v12, %v1280_v14 }
 0x4a2   : > { %v1283_v16 = vpack.c.b16 %v1282_v15, %v1282_v15  ;;  %v1239_v17 = vpop.f32.mrf.mxu1 }
 0x4a4   : > { %v2181_v18 = vpop.f32.mrf.mxu1 }
 0x4a6   : > { %v1242_v21 = vpop.f32.mrf.mxu1 }
 0x4a8   : > { %v2182_v22 = vpop.f32.mrf.mxu1 }
 0x4fd   : > { %v826_v29 = vpop.permute.xlu0 %825 }
 0x4fe   : > { %829 = vst.msk [vmem:[#allocation2] sm:$0xf] %vm828_vm12, %v826_v29  ;;  %v1133_v29 = vrot.slane %v2867_v30, 5 }
 0x505   : > { %v942_v41 = vpop.permute.xlu1 %941 }
 0x506   : > { %945 = vst.msk [vmem:[#allocation2] sm:$0xf] %vm944_vm13, %v942_v41 }
 0x50d   : > { %v1058_v57 = vpop.permute.xlu0 %1057 }
 0x50e   : > { %1061 = vst.msk [vmem:[#allocation2] sm:$0xf] %vm1060_vm14, %v1058_v57 }
 0x515   : > { %v1062_v11 = vld [vmem:[#allocation2] sm:$0xf] }
 0x516   : > { %v1063_v13 = vpack.c.bf16 %v1062_v11, %v1062_v11 }
 0x518   : > { %2172 = vmatmul.mubr.msk.bf16.vlgmr.msra.gmra.mxu0 %vm452_vm8, %v1063_v13 }
 0x519   : > { %2184 = vmatpush3.bf16.msra.mxu0 %v2842_v1  ;;  %2187 = vmatprep.mubr.msk.bf16.mxu0 %vm2607_vm0, %v2606_v0  ;;  %v1240_v1 = vadd.f32 %v2902_v6, %v1239_v17 }
 0x51a   : > { %2185 = vmatprep.subr.bf16.mxu0 %v2606_v0 }
 0x51b   : > { %v1327_v20 = vpack.c.bf16 %v1240_v1, %v1240_v1 }
 0x51d   : > { %2186 = vmatpush3.bf16.msra.mxu0 %v2847_v3  ;;  %1438 = vrot.lane.b32.xlu0 %v1327_v20, %s2609_s24  ;;  %v1129_v3 = vrot.slane %v2860_v24, 7 }
 0x51e   : > { %2197 = vmatprep.subr.bf16.mxu0 %v2606_v0 }
 0x51f   : > { %v1130_v6 = vsel %vm431_vm1, %v1129_v3, %v2856_v19 }
 0x520   : > { %2188 = vmatmul.mubr.msk.bf16.vlgmr.msra.gmra.mxu0 %vm452_vm8, %v1283_v16  ;;  %v1132_v31 = vsel %vm434_vm2, %v1131_v23, %v1130_v6 }
 0x521   : > { %2199 = vmatprep.mubr.msk.bf16.mxu0 %vm2607_vm0, %v2606_v0  ;;  %1553 = vrot.lane.b32.xlu0 %v1327_v20, %s2608_s19  ;;  %v1134_v25 = vsel %vm437_vm3, %v1133_v29, %v1132_v31 }
 0x525   : > { %1668 = vrot.lane.b32.xlu0 %v1327_v20, %s2610_s17 }
 0x58f   : > { %v1439_v54 = vpop.permute.xlu0 %1438 }
 0x593   : > { %v1554_v60 = vpop.permute.xlu0 %1553 }
 0x597   : > { %v1669_v62 = vpop.permute.xlu0 %1668 }
 0x5d8   : > { %v1119_v24 = vpop.f32.mrf.mxu0 }
 0x5d9   : > { %v1120_v34 = vadd.f32 %v3049_v10, %v1119_v24 }
 0x5da   : > { %v2173_v19 = vpop.f32.mrf.mxu0 }
 0x5db   : > { %v1136_v36 = vadd.f32 %v1134_v25, %v1120_v34 }
 0x5dc   : > { %v1122_v30 = vpop.f32.mrf.mxu0 }
 0x5dd   : > { %v1144_v37 = vrot.slane %v1136_v36, %v3053_v35 }
 0x5de   : > { %v2174_v38 = vpop.f32.mrf.mxu0 }
 0x5df   : > { %v1145_v39 = vcombine.high %v1144_v37, %v1144_v37  ;;  %v1152_v40 = vrot.slane %v1144_v37, %v3053_v35 }
 0x5e0   : > { %v1321_v41 = vpop.f32.mrf.mxu0 }
 0x5e1   : > { %v1159_v42 = vrot.slane %v1145_v39, %v3053_v35  ;;  %v1160_v43 = vcombine.high %v1152_v40, %v1152_v40  ;;  %1167 = vst.msk [vmem:[%s3060_s16] sm:$0x1] %vm1166_vm15, %v1152_v40  ;;  %v1322_v44 = vadd.f32 %v2897_v63, %v1321_v41 }
 0x5e2   : > { %v2189_v45 = vpop.f32.mrf.mxu0 }
 0x5e3   : > { %v1161_v46 = vcombine.high %v1159_v42, %v1159_v42  ;;  %1168 = vst.msk [vmem:[%s3060_s16 + $0x2] sm:$0x1] %vm1166_vm15, %v1159_v42  ;;  %1169 = vst.msk [vmem:[%s3060_s16 + $0x4] sm:$0x1] %vm1166_vm15, %v1160_v43  ;;  %v3069_v47 = vpack.c.bf16 %v1322_v44, %v1322_v44 }
 0x5e4   : > { %v1324_v2 = vpop.f32.mrf.mxu0 }
 0x5e5   : > { %1170 = vst.msk [vmem:[%s3060_s16 + $0x6] sm:$0x1] %vm1166_vm15, %v1161_v46  ;;  %1440 = vrot.lane.b32.xlu1 %v3069_v47, %s2609_s24  ;;  %v1333_v48 = vsel %vm602_vm9, %v3069_v47, 0 }
 0x5e6   : > { %v2190_v4 = vpop.f32.mrf.mxu0  ;;  %2192 = vmatpush3.bf16.xpose.msra.mxu1 %v1333_v48 }
 0x5e7   : > { %2203 = vmatprep.subr.bf16.mxu1 %v2606_v0 }
 0x5e9   : > { %1555 = vrot.lane.b32.xlu1 %v3069_v47, %s2608_s19  ;;  %s1887_s19 = sshll.u32 %s3060_s16, 4  ;;  %s3164_s19 = int_to_ptr.vmem [resolvable:$true] %s1887_s19 }
 0x5ed   : > { %1670 = vrot.lane.b32.xlu1 %v3069_v47, %s2610_s17  ;;  %2194 = vmatmul.mubr.msk.bf16.vlgmr.msra.gmra.mxu1 %vm602_vm9, %v1327_v20 }
 0x5ee   : > { %2205 = vmatprep.mubr.msk.bf16.mxu1 %vm2607_vm0, %v2606_v0 }
 0x657   : > { %v1441_v63 = vpop.permute.xlu1 %1440 }
 0x658   : > { %v1446_v51 = vsel %vm602_vm9, %v1441_v63, 0 }
 0x659   : > { %2204 = vmatpush3.bf16.xpose.msra.mxu1 %v1446_v51 }
 0x65a   : > { %2215 = vmatprep.subr.bf16.mxu1 %v2606_v0 }
 0x65b   : > { %v1556_v52 = vpop.permute.xlu1 %1555 }
 0x65c   : > { %v1561_v57 = vsel %vm602_vm9, %v1556_v52, 0 }
 0x65f   : > { %v1671_v59 = vpop.permute.xlu1 %1670 }
 0x660   : > { %2206 = vmatmul.mubr.msk.bf16.vlgmr.msra.gmra.mxu1 %vm602_vm9, %v1439_v54  ;;  %v1676_v61 = vsel %vm602_vm9, %v1671_v59, 0 }
 0x661   : > { %2216 = vmatpush3.bf16.xpose.msra.mxu1 %v1561_v57  ;;  %2217 = vmatprep.mubr.msk.bf16.mxu1 %vm2607_vm0, %v2606_v0 }
 0x662   : > { %2227 = vmatprep.subr.bf16.mxu1 %v2606_v0 }
 0x668   : > { %2218 = vmatmul.mubr.msk.bf16.vlgmr.msra.gmra.mxu1 %vm602_vm9, %v1554_v60 }
 0x669   : > { %2228 = vmatpush3.bf16.xpose.msra.mxu1 %v1676_v61  ;;  %2229 = vmatprep.mubr.msk.bf16.mxu1 %vm2607_vm0, %v2606_v0 }
 0x66a   : > { %2239 = vmatprep.subr.bf16.mxu1 %v2606_v0 }
 0x670   : > { %2230 = vmatmul.mubr.msk.bf16.vlgmr.msra.gmra.mxu1 %vm602_vm9, %v1669_v62 }
 0x671   : > { %2240 = vmatpush3.bf16.msra.mxu1 %v2980_v49  ;;  %2243 = vmatprep.mubr.msk.bf16.mxu1 %vm2607_vm0, %v2606_v0 }
 0x672   : > { %2241 = vmatprep.subr.bf16.mxu1 %v2606_v0 }
 0x675   : > { %2242 = vmatpush3.bf16.msra.mxu1 %v2983_v50 }
 0x6ad   : > { %v1369_v5 = vpop.f32.mrf.mxu1 }
 0x6ae   : > { %v1375_v7 = vsel %vm649_vm10, %v1369_v5, -inf }
 0x6af   : > { %1376 = vmax.xlane.f32.xlu1 %v1375_v7  ;;  %v2195_v8 = vpop.f32.mrf.mxu1 }
 0x6b1   : > { %v1372_v9 = vpop.f32.mrf.mxu1 }
 0x6b3   : > { %v2196_v11 = vpop.f32.mrf.mxu1 }
 0x720   : > { %v1482_v12 = vpop.f32.mrf.mxu1 }
 0x721   : > { %v1488_v13 = vsel %vm649_vm10, %v1482_v12, -inf }
 0x722   : > { %1489 = vmax.xlane.f32.xlu0 %v1488_v13  ;;  %v2207_v14 = vpop.f32.mrf.mxu1 }
 0x724   : > { %v1485_v49 = vpop.f32.mrf.mxu1 }
 0x726   : > { %v2208_v15 = vpop.f32.mrf.mxu1 }
 0x728   : > { %v1597_v16 = vpop.f32.mrf.mxu1 }
 0x729   : > { %v1603_v17 = vsel %vm649_vm10, %v1597_v16, -inf }
 0x72a   : > { %1604 = vmax.xlane.f32.xlu0 %v1603_v17  ;;  %v2219_v1 = vpop.f32.mrf.mxu1 }
 0x72c   : > { %v1600_v50 = vpop.f32.mrf.mxu1 }
 0x72e   : > { %v2220_v18 = vpop.f32.mrf.mxu1 }
 0x730   : > { %v1712_v20 = vpop.f32.mrf.mxu1 }
 0x731   : > { %v1718_v21 = vsel %vm649_vm10, %v1712_v20, -inf }
 0x732   : > { %1719 = vmax.xlane.f32.xlu1 %v1718_v21  ;;  %v2231_v22 = vpop.f32.mrf.mxu1 }
 0x734   : > { %v1715_v3 = vpop.f32.mrf.mxu1 }
 0x736   : > { %v2232_v23 = vpop.f32.mrf.mxu1 }
 0x738   : > { %v1377_v26 = vpop.xlane.xlu1 %1376 }
 0x739   : > { %v1378_v27 = vsub.f32 %v1369_v5, %v1377_v26 }
 0x73b   : > { %v1379_v28 = vmul.f32 1.442695, %v1378_v27 }
 0x73d   : > { %2375 = vpow2.f32 %v1379_v28 }
 0x74a   : > { %v2376_v6 = vpop.eup %2375 }
 0x74b   : > { %v1381_v29 = vsel %vm649_vm10, %v2376_v6, 0.0 }
 0x74c   : > { %1382 = vadd.xlane.f32.xlu0 %v1381_v29 }
 0x7ab   : > { %v1490_v31 = vpop.xlane.xlu0 %1489 }
 0x7ac   : > { %v1491_v32 = vsub.f32 %v1482_v12, %v1490_v31 }
 0x7ae   : > { %v1492_v33 = vmul.f32 1.442695, %v1491_v32 }
 0x7b0   : > { %2377 = vpow2.f32 %v1492_v33  ;;  %v1832_v33 = vrot.slane %v2990_v53, 7 }
 0x7b3   : > { %v1605_v24 = vpop.xlane.xlu0 %1604 }
 0x7b4   : > { %v1606_v25 = vsub.f32 %v1597_v16, %v1605_v24  ;;  %v1834_v24 = vrot.slane %v2996_v56, 6 }
 0x7b6   : > { %v1607_v34 = vmul.f32 1.442695, %v1606_v25  ;;  %v1833_v25 = vsel %vm431_vm1, %v1832_v33, %v2993_v55 }
 0x7b8   : > { %2379 = vpow2.f32 %v1607_v34  ;;  %v1836_v34 = vrot.slane %v2999_v58, 5 }
 0x7bb   : > { %v1720_v38 = vpop.xlane.xlu1 %1719 }
 0x7bc   : > { %v1721_v39 = vsub.f32 %v1712_v20, %v1720_v38 }
 0x7bd   : > { %v2378_v19 = vpop.eup %2377 }
 0x7be   : > { %v1494_v36 = vsel %vm649_vm10, %v2378_v19, 0.0  ;;  %v1722_v40 = vmul.f32 1.442695, %v1721_v39 }
 0x7bf   : > { %1495 = vadd.xlane.f32.xlu1 %v1494_v36 }
 0x7c0   : > { %2381 = vpow2.f32 %v1722_v40 }
 0x7c5   : > { %v2380_v30 = vpop.eup %2379 }
 0x7c6   : > { %v1609_v37 = vsel %vm649_vm10, %v2380_v30, 0.0 }
 0x7c7   : > { %1610 = vadd.xlane.f32.xlu0 %v1609_v37 }
 0x7cd   : > { %v2382_v41 = vpop.eup %2381 }
 0x7ce   : > { %v1724_v42 = vsel %vm649_vm10, %v2382_v41, 0.0 }
 0x7d0   : > { %1500 = vrot.lane.b32.xlu1 %v3069_v47, %s2614_s14 }
 0x7d5   : > { %v1383_v43 = vpop.xlane.xlu0 %1382 }
 0x7d6   : > { %2383 = vrcp.f32 %v1383_v43 }
 0x7dd   : > { %1388 = vrot.lane.b32.xlu0 %v3069_v47, %s2611_s18  ;;  %s3162_s18 = scalar_lea.hbm %s3221_s8, %s2052_s2 }
 0x7e1   : > { %1730 = vrot.lane.b32.xlu0 %v3069_v47, %s2613_s21  ;;  %s2619_s21 = smov [#allocation12]  }
 0x7e2   : > { %s2527_s14 = sshll.u32 %s2619_s21, 4  ;;  %s2528_s14 = int_to_ptr.vmem [resolvable:$false] %s2527_s14 }
 0x7e3   : > { %v2384_v45 = vpop.eup %2383  ;;  %p2530_p7 = scmp.lt.s32.totalorder %s3164_s19, %s2528_s14 }
 0x7e4   : > { %v1385_v2 = vmul.f32 %v2384_v45, %v2376_v6 }
 0x7e6   : > { %v1386_v51 = vpack.c.bf16 %v1385_v2, %v1385_v2 }
 0x7f4   : > { %1725 = vadd.xlane.f32.xlu1 %v1724_v42 }
 0x805   : > { %1615 = vrot.lane.b32.xlu1 %v3069_v47, %s2612_s10  ;;  %s2523_s10 = scalar_lea.vmem %s3164_s19, 128 }
 0x806   : > { %p2524_p12 = scmp.ne.s32.totalorder %s3164_s19, %s2523_s10 }
 0x808   : > { %p2525_p0 = pnand %p2524_p12, %p3247_p10 }
 0x80a   : > { %p2526_p3 = pneg %p2525_p0 }
 0x848   : > { %v1496_v44 = vpop.xlane.xlu1 %1495 }
 0x849   : > { %2385 = vrcp.f32 %v1496_v44 }
 0x84c   : > { %v1501_v63 = vpop.permute.xlu1 %1500 }
 0x84d   : > { %v1506_v54 = vsel %vm668_vm11, %v1501_v63, 0 }
 0x850   : > { %v1611_v46 = vpop.xlane.xlu0 %1610 }
 0x851   : > { %2387 = vrcp.f32 %v1611_v46 }
 0x854   : > { %v1389_v48 = vpop.permute.xlu0 %1388 }
 0x855   : > { %v1394_v4 = vsel %vm668_vm11, %v1389_v48, 0 }
 0x856   : > { %2198 = vmatpush3.bf16.msra.mxu0 %v1394_v4  ;;  %v2386_v52 = vpop.eup %2385 }
 0x857   : > { %2209 = vmatprep.subr.bf16.mxu0 %v2606_v0  ;;  %v1498_v47 = vmul.f32 %v2386_v52, %v2378_v19  ;;  %v1835_v19 = vsel %vm434_vm2, %v1834_v24, %v1833_v25 }
 0x858   : > { %v1731_v7 = vpop.permute.xlu0 %1730 }
 0x859   : > { %2200 = vmatmul.mubr.msk.bf16.vlgmr.msra.gmra.mxu0 %vm602_vm9, %v1386_v51  ;;  %v1499_v57 = vpack.c.bf16 %v1498_v47, %v1498_v47  ;;  %v1736_v9 = vsel %vm668_vm11, %v1731_v7, 0 }
 0x85a   : > { %2210 = vmatpush3.bf16.msra.mxu0 %v1506_v54  ;;  %2211 = vmatprep.mubr.msk.bf16.mxu0 %vm2607_vm0, %v2606_v0 }
 0x85b   : > { %2221 = vmatprep.subr.bf16.mxu0 %v2606_v0 }
 0x85e   : > { %v2388_v59 = vpop.eup %2387 }
 0x85f   : > { %v1613_v61 = vmul.f32 %v2388_v59, %v2380_v30  ;;  %v1837_v30 = vsel %vm437_vm3, %v1836_v34, %v1835_v19 }
 0x861   : > { %2212 = vmatmul.mubr.msk.bf16.vlgmr.msra.gmra.mxu0 %vm602_vm9, %v1499_v57  ;;  %v1614_v8 = vpack.c.bf16 %v1613_v61, %v1613_v61 }
 0x862   : > { %2223 = vmatprep.mubr.msk.bf16.mxu0 %vm2607_vm0, %v2606_v0 }
 0x87d   : > { %v1726_v60 = vpop.xlane.xlu1 %1725 }
 0x87e   : > { %2389 = vrcp.f32 %v1726_v60 }
 0x881   : > { %v1616_v62 = vpop.permute.xlu1 %1615 }
 0x882   : > { %v1621_v5 = vsel %vm668_vm11, %v1616_v62, 0 }
 0x883   : > { %2222 = vmatpush3.bf16.msra.mxu0 %v1621_v5 }
 0x884   : > { %2233 = vmatprep.subr.bf16.mxu0 %v2606_v0 }
 0x886   : > { %2224 = vmatmul.mubr.msk.bf16.vlgmr.msra.gmra.mxu0 %vm602_vm9, %v1614_v8 }
 0x887   : > { %2234 = vmatpush3.bf16.msra.mxu0 %v1736_v9  ;;  %2235 = vmatprep.mubr.msk.bf16.mxu0 %vm2607_vm0, %v2606_v0 }
 0x88b   : > { %v2390_v11 = vpop.eup %2389 }
 0x88c   : > { %v1728_v12 = vmul.f32 %v2390_v11, %v2382_v41 }
 0x88e   : > { %v1729_v13 = vpack.c.bf16 %v1728_v12, %v1728_v12 }
 0x890   : > { %2236 = vmatmul.mubr.msk.bf16.vlgmr.msra.gmra.mxu0 %vm602_vm9, %v1729_v13 }
 0x919   : > { %v1430_v14 = vpop.f32.mrf.mxu0 }
 0x91a   : > { %1436 = vst.msk [vmem:[#allocation2] sm:$0xf] %vm649_vm10, %v1430_v14 }
 0x91b   : > { %v2201_v49 = vpop.f32.mrf.mxu0 }
 0x91d   : > { %v1433_v15 = vpop.f32.mrf.mxu0 }
 0x91f   : > { %v2202_v16 = vpop.f32.mrf.mxu0 }
 0x921   : > { %v1542_v17 = vpop.f32.mrf.mxu0 }
 0x922   : > { %1549 = vrot.lane.b32.xlu1 %v1542_v17, %s2615_s26  ;;  %s2529_s26 = scalar_lea.vmem %s2528_s14, 256 }
 0x923   : > { %v2213_v1 = vpop.f32.mrf.mxu0  ;;  %p2531_p9 = scmp.lt.s32.totalorder %s2529_s26, %s2523_s10 }
 0x925   : > { %v1545_v50 = vpop.f32.mrf.mxu0  ;;  %p2532_p1 = por %p2531_p9, %p2530_p7 }
 0x927   : > { %v2214_v18 = vpop.f32.mrf.mxu0  ;;  %p2533_p13 = pnand %p2532_p1, %p2526_p3 }
 0x946   : > { %v1657_v20 = vpop.f32.mrf.mxu0 }
 0x947   : > { %1664 = vrot.lane.b32.xlu0 %v1657_v20, %s2616_s11 }
 0x948   : > { %v2225_v0 = vpop.f32.mrf.mxu0 }
 0x94a   : > { %v1660_v21 = vpop.f32.mrf.mxu0 }
 0x94c   : > { %v2226_v22 = vpop.f32.mrf.mxu0 }
 0x950   : > { %v1772_v3 = vpop.f32.mrf.mxu0 }
 0x951   : > { %1779 = vrot.lane.b32.xlu1 %v1772_v3, %s2617_s13 }
 0x952   : > { %v2237_v23 = vpop.f32.mrf.mxu0 }
 0x954   : > { %v1775_v26 = vpop.f32.mrf.mxu0 }
 0x956   : > { %v2238_v27 = vpop.f32.mrf.mxu0 }
 0x994   : > { %v1550_v28 = vpop.permute.xlu1 %1549 }
 0x995   : > { %1552 = vst.msk [vmem:[#allocation2] sm:$0xf] %vm828_vm12, %v1550_v28 }
 0x9b9   : > { %v1665_v6 = vpop.permute.xlu0 %1664 }
 0x9ba   : > { %1667 = vst.msk [vmem:[#allocation2] sm:$0xf] %vm944_vm13, %v1665_v6 }
 0x9c3   : > { %v1780_v29 = vpop.permute.xlu1 %1779 }
 0x9c4   : > { %1782 = vst.msk [vmem:[#allocation2] sm:$0xf] %vm1060_vm14, %v1780_v29 }
 0x9cb   : > { %v1783_v31 = vld [vmem:[#allocation2] sm:$0xf] }
 0x9cc   : > { %v1784_v32 = vpack.c.bf16 %v1783_v31, %v1783_v31 }
 0x9ce   : > { %2244 = vmatmul.mubr.msk.bf16.vlgmr.msra.gmra.mxu1 %vm452_vm8, %v1784_v32 }
 0xa8e   : > { %v1822_v36 = vpop.f32.mrf.mxu1 }
 0xa8f   : > { %v1823_v37 = vadd.f32 %v3049_v10, %v1822_v36 }
 0xa90   : > { %v2245_v38 = vpop.f32.mrf.mxu1 }
 0xa91   : > { %v1839_v53 = vadd.f32 %v1837_v30, %v1823_v37 }
 0xa92   : > { %v1825_v39 = vpop.f32.mrf.mxu1 }
 0xa93   : > { %v1847_v56 = vrot.slane %v1839_v53, %v3053_v35 }
 0xa94   : > { %v2246_v55 = vpop.f32.mrf.mxu1 }
 0xa95   : > { %v1848_v40 = vcombine.high %v1847_v56, %v1847_v56  ;;  %v1855_v58 = vrot.slane %v1847_v56, %v3053_v35 }
 0xa97   : > { %v1862_v41 = vrot.slane %v1848_v40, %v3053_v35  ;;  %v1863_v42 = vcombine.high %v1855_v58, %v1855_v58  ;;  %1869 = vst.msk [vmem:[%s3060_s16 + $0x1] sm:$0x1] %vm1166_vm15, %v1855_v58 }
 0xa99   : > { %v1864_v10 = vcombine.high %v1862_v41, %v1862_v41  ;;  %1870 = vst.msk [vmem:[%s3060_s16 + $0x3] sm:$0x1] %vm1166_vm15, %v1862_v41  ;;  %1871 = vst.msk [vmem:[%s3060_s16 + $0x5] sm:$0x1] %vm1166_vm15, %v1863_v42 }
 0xa9b   : > { %1872 = vst.msk [vmem:[%s3060_s16 + $0x7] sm:$0x1] %vm1166_vm15, %v1864_v10 }
 0xa9c   : > { %2536 = shalt.err (!%p2533_p13)
}
 0xa9d   : > { %s2537_s11 = scalar_lea.hbm %s3162_s18, 128  ;;  %s2541_s15 = scalar_lea.hbm %s3221_s8, 256 }
 0xa9e   : > { %p2538_p6 = scmp.ne.s32.totalorder %s3162_s18, %s2537_s11  ;;  %p2542_p5 = scmp.lt.s32.totalorder %s3162_s18, %s3221_s8 }
 0xa9f   : > { %p2543_p11 = scmp.lt.s32.totalorder %s2541_s15, %s2537_s11 }
 0xaa0   : > { %p2539_p4 = pnand %p2538_p6, %p3247_p10 }
 0xaa1   : > { %p2544_p2 = por %p2543_p11, %p2542_p5 }
 0xaa2   : > { %p2540_p8 = pneg %p2539_p4 }
 0xaa4   : > { %p2545_p12 = pnand %p2544_p2, %p2540_p8 }
 0xaa6   : > { %2548 = shalt.err (!%p2545_p12)
}
 0xaa7   : > { %s2620_s24 = smov 32   ;;  %s2621_s17 = smov 2  }
 0xaa8   : > { %2265 = dma.vmem_to_hbm [thread:$0]  (%p3247_p10), %s3164_s19, 128, %s3162_s18, %s1874_s9, %s2620_s24, %s2620_s24, %s2621_s17  }
 0xaa9 PF: > { %s1902_s10 = sand.u32 1, %s2583_s27   ;;  %p3248_p0 = scmp.ne.s32.totalorder %s3231_s12, 0 }
 0xaaa   : > { %p3249_p3 = scmp.ge.s32.totalorder %s2595_s30, 2  ;;  %s1903_s21 = scalar_lea.sflag [#allocation5], %s1902_s10 }
 0xaac   : > { %p2285_p7 = pnand %p3249_p3, %p3248_p0 }
 0xaae   : > { %p2286_p9 = pneg %p2285_p7 }
 0xab0   : > { %2578 = dma.done.wait (%p2286_p9), %s1903_s21, 128  }
 0xab1   : > { %2580 = vsyncadd (%p2286_p9), %s1903_s21, 4294967168  ;;  %p23_p1 = scmp.ge.s32.totalorder %s2758_s25, 4   ;;  %s3250_s27 = smov %s2587_s28 }
 0xab2   : > { %s3251_s28 = smov %s2591_s29  ;;  %s3252_s29 = smov %s2774_s23 }
 0xab3   : > { %s3253_s30 = smov %s2758_s25  ;;  %25 = sbr.rel (!%p23_p1) target bundleno = 10 (0xa), region = 113 }
 0xab8   :  { %1908 = vsyncpa [#allocation4], 1 }
 0xab9   :  { %1910 = vsyncpa [#allocation4 + $0x1], 1 }
 0xaba   :  { %1911 = vsyncpa [#allocation7], 1 }
 0xabb   :  { %1912 = vsyncpa [#allocation10], 1 }
 0xabc   :  { %1913 = vsyncpa [#allocation5], 1 }
 0xabd   :  { %1915 = vsyncpa [#allocation5 + $0x1], 1 }

</bundles_post_ra>
